<compile_context>
chip_gen: v7x
topology: tpu7x:2x2x1
jax: 0.10.0
libtpu: 0.0.40
codegen_flags: <defaults>
</compile_context>

<pallas_src>
import jax
import jax.numpy as jnp
from jax.experimental import pallas as pl
from jax.experimental.pallas import tpu as pltpu

IN_DIM = 5
H1, H2, H3 = 512, 256, 128
OUT_DIM = 1
OUT_PAD = 128          # lane-dense padded output width
BN_EPS = 1e-5


# --------------------------------------------------------------------------
# Kernel
# --------------------------------------------------------------------------
def revival_dnn_kernel(x_ref,
                       w1_ref, c1_ref,
                       w2_ref, c2_ref,
                       w3_ref, c3_ref,
                       w4_ref, b4_ref,
                       o_ref):
    # MXU dots use bf16 operands + f32 accumulation; elementwise stays f32.
    x = x_ref[...].astype(jnp.bfloat16)

    # layer 1: Linear(5,512) with BN1d(512) folded into w1/c1, then ReLU
    h = jnp.dot(x, w1_ref[...], preferred_element_type=jnp.float32)
    h = jnp.maximum(h + c1_ref[...], 0.0)

    # layer 2: Linear(512,256) with folded BN1d(256), then ReLU
    h = jnp.dot(h.astype(jnp.bfloat16), w2_ref[...],
                preferred_element_type=jnp.float32)
    h = jnp.maximum(h + c2_ref[...], 0.0)

    # layer 3: Linear(256,128) with folded BN1d(128), then ReLU
    h = jnp.dot(h.astype(jnp.bfloat16), w3_ref[...],
                preferred_element_type=jnp.float32)
    h = jnp.maximum(h + c3_ref[...], 0.0)

    # layer 4: Linear(128,1) padded to 128 output lanes (cols 1.. are zero)
    o_ref[...] = (jnp.dot(h.astype(jnp.bfloat16), w4_ref[...],
                          preferred_element_type=jnp.float32)
                  + b4_ref[...])


# --------------------------------------------------------------------------
# Parameter construction / folding
# --------------------------------------------------------------------------
def make_raw_params(key):
    """PyTorch-default-initialized raw parameters (fresh BatchNorm stats)."""
    ks = jax.random.split(key, 8)

    def linear(kw, kb, fan_in, fan_out):
        bound = 1.0 / jnp.sqrt(jnp.float32(fan_in))
        w = jax.random.uniform(kw, (fan_in, fan_out), jnp.float32, -bound, bound)
        b = jax.random.uniform(kb, (fan_out,), jnp.float32, -bound, bound)
        return w, b

    w1, b1 = linear(ks[0], ks[1], IN_DIM, H1)
    w2, b2 = linear(ks[2], ks[3], H1, H2)
    w3, b3 = linear(ks[4], ks[5], H2, H3)
    w4, b4 = linear(ks[6], ks[7], H3, OUT_DIM)

    def bn(n):
        # gamma=1, beta=0, running_mean=0, running_var=1
        return (jnp.ones((n,), jnp.float32), jnp.zeros((n,), jnp.float32),
                jnp.zeros((n,), jnp.float32), jnp.ones((n,), jnp.float32))

    return dict(w1=w1, b1=b1, bn1=bn(H1),
                w2=w2, b2=b2, bn2=bn(H2),
                w3=w3, b3=b3, bn3=bn(H3),
                w4=w4, b4=b4.reshape(1, OUT_DIM))


def prepare_params(raw):
    """Fold Linear bias + inference BN into (bf16 weight, f32 shift) pairs."""
    def fold(w, b, bn_stats):
        gamma, beta, mean, var = bn_stats
        scale = gamma / jnp.sqrt(var + BN_EPS)                     # (N,)
        w_folded = (w * scale[None, :]).astype(jnp.bfloat16)       # (K, N)
        shift = (beta + (b - mean) * scale).reshape(1, -1).astype(jnp.float32)
        return w_folded, shift

    w1, c1 = fold(raw["w1"], raw["b1"], raw["bn1"])
    w2, c2 = fold(raw["w2"], raw["b2"], raw["bn2"])
    w3, c3 = fold(raw["w3"], raw["b3"], raw["bn3"])

    # pad final layer to a lane-dense 128-wide output (zero extra columns)
    w4 = jnp.zeros((H3, OUT_PAD), jnp.float32).at[:, :OUT_DIM].set(raw["w4"])
    b4 = jnp.zeros((1, OUT_PAD), jnp.float32).at[:, :OUT_DIM].set(raw["b4"])

    return dict(w1=w1, c1=c1, w2=w2, c2=c2, w3=w3, c3=c3,
                w4=w4.astype(jnp.bfloat16), b4=b4)


# --------------------------------------------------------------------------
# Wrapper
# --------------------------------------------------------------------------
def revival_dnn_forward(x, params, *, block_b=256):
    B = x.shape[0]
    b_pad = ((B + block_b - 1) // block_b) * block_b
    if b_pad != B:
        x = jnp.pad(x, ((0, b_pad - B), (0, 0)))

    full = lambda shape: pl.BlockSpec(shape, lambda i: (0, 0))

    grid_spec = pltpu.PrefetchScalarGridSpec(
        num_scalar_prefetch=0,
        grid=(b_pad // block_b,),
        in_specs=[
            pl.BlockSpec((block_b, IN_DIM), lambda i: (i, 0)),    # x
            full((IN_DIM, H1)), full((1, H1)),                    # w1, c1
            full((H1, H2)),     full((1, H2)),                    # w2, c2
            full((H2, H3)),     full((1, H3)),                    # w3, c3
            full((H3, OUT_PAD)), full((1, OUT_PAD)),              # w4, b4
        ],
        out_specs=pl.BlockSpec((block_b, OUT_PAD), lambda i: (i, 0)),
    )

    flops = 2 * b_pad * (IN_DIM * H1 + H1 * H2 + H2 * H3 + H3 * OUT_PAD)
    weight_bytes = 2 * (IN_DIM * H1 + H1 * H2 + H2 * H3 + H3 * OUT_PAD)
    bytes_accessed = b_pad * IN_DIM * 4 + b_pad * OUT_PAD * 4 + weight_bytes

    out = pl.pallas_call(
        revival_dnn_kernel,
        out_shape=jax.ShapeDtypeStruct((b_pad, OUT_PAD), jnp.float32),
        grid_spec=grid_spec,
        compiler_params=pltpu.CompilerParams(
            dimension_semantics=("parallel",)),
        cost_estimate=pl.CostEstimate(
            flops=flops, transcendentals=0, bytes_accessed=int(bytes_accessed)),
    )(x,
      params["w1"], params["c1"],
      params["w2"], params["c2"],
      params["w3"], params["c3"],
      params["w4"], params["b4"])

    return out[:B, :OUT_DIM]


# --------------------------------------------------------------------------
# References
# --------------------------------------------------------------------------
def reference_forward_bf16(x, params):
    """Plain-JAX reference using the same folded/bf16 math path as the kernel."""
    def dot(a, w):
        return jnp.dot(a.astype(jnp.bfloat16), w,
                       preferred_element_type=jnp.float32)
    h = jnp.maximum(dot(x, params["w1"]) + params["c1"], 0.0)
    h = jnp.maximum(dot(h, params["w2"]) + params["c2"], 0.0)
    h = jnp.maximum(dot(h, params["w3"]) + params["c3"], 0.0)
    return (dot(h, params["w4"]) + params["b4"])[:, :OUT_DIM]


def reference_forward_f32(x, raw):
    """Full-f32 eval-mode PyTorch semantics (running-stats BN, dropout = id)."""
    def layer(h, w, b, bn_stats):
        gamma, beta, mean, var = bn_stats
        h = h @ w + b
        h = (h - mean) / jnp.sqrt(var + BN_EPS) * gamma + beta
        return jnp.maximum(h, 0.0)
    h = layer(x, raw["w1"], raw["b1"], raw["bn1"])
    h = layer(h, raw["w2"], raw["b2"], raw["bn2"])
    h = layer(h, raw["w3"], raw["b3"], raw["bn3"])
    return h @ raw["w4"] + raw["b4"]


# --------------------------------------------------------------------------
# Demo / self-test
# --------------------------------------------------------------------------
if __name__ == "__main__":
    key = jax.random.PRNGKey(0)
    kx, kp = jax.random.split(key)

    raw = make_raw_params(kp)
    params = prepare_params(raw)

    # main test: small batch (padded inside the wrapper to one 256-row tile)
    B_small = 8
    x_small = jax.random.normal(kx, (B_small, IN_DIM), dtype=jnp.float32)

    out_small = jax.block_until_ready(revival_dnn_forward(x_small, params))
    assert out_small.shape == (B_small, OUT_DIM)

    ref_bf16 = reference_forward_bf16(x_small, params)
    assert jnp.allclose(out_small, ref_bf16, atol=1e-2, rtol=1e-2), (
        "bf16-path mismatch, max abs err = %f"
        % float(jnp.max(jnp.abs(out_small - ref_bf16))))

    ref_f32 = reference_forward_f32(x_small, raw)
    assert jnp.allclose(out_small, ref_f32, atol=1.5e-1, rtol=1.5e-1), (
        "f32-reference mismatch, max abs err = %f"
        % float(jnp.max(jnp.abs(out_small - ref_f32))))

    # grid test: two 256-row tiles -> exercises the batch grid / megacore path
    B_grid = 512
    x_grid = jax.random.normal(kx, (B_grid, IN_DIM), dtype=jnp.float32)
    out_grid = jax.block_until_ready(revival_dnn_forward(x_grid, params))
    assert out_grid.shape == (B_grid, OUT_DIM)
    ref_grid = reference_forward_bf16(x_grid, params)
    assert jnp.allclose(out_grid, ref_grid, atol=1e-2, rtol=1e-2), (
        "grid-path mismatch, max abs err = %f"
        % float(jnp.max(jnp.abs(out_grid - ref_grid))))

    print("KERNEL_OK")
</pallas_src>

<mosaic_0001>
module attributes {stable_mosaic.version = 11 : i64} {
  func.func @revival_dnn_kernel(%arg0: i32, %arg1: memref<256x5xf32, #tpu.memory_space<vmem>>, %arg2: memref<5x512xbf16, #tpu.memory_space<vmem>>, %arg3: memref<1x512xf32, #tpu.memory_space<vmem>>, %arg4: memref<512x256xbf16, #tpu.memory_space<vmem>>, %arg5: memref<1x256xf32, #tpu.memory_space<vmem>>, %arg6: memref<256x128xbf16, #tpu.memory_space<vmem>>, %arg7: memref<1x128xf32, #tpu.memory_space<vmem>>, %arg8: memref<128x128xbf16, #tpu.memory_space<vmem>>, %arg9: memref<1x128xf32, #tpu.memory_space<vmem>>, %arg10: memref<256x128xf32, #tpu.memory_space<vmem>>) attributes {dimension_semantics = [#tpu.dimension_semantics<parallel>], iteration_bounds = array<i64: 1>, scalar_prefetch = 0 : i64, scratch_operands = 0 : i64, tpu.core_type = #tpu.core_type<tc>, window_params = [{transform_indices = @transform_0, window_bounds = array<i64: 256, 5>}, {pipeline_mode = #tpu.pipeline_mode<synchronous>, transform_indices = @transform_1, window_bounds = array<i64: 5, 512>}, {pipeline_mode = #tpu.pipeline_mode<synchronous>, transform_indices = @transform_2, window_bounds = array<i64: 1, 512>}, {pipeline_mode = #tpu.pipeline_mode<synchronous>, transform_indices = @transform_3, window_bounds = array<i64: 512, 256>}, {pipeline_mode = #tpu.pipeline_mode<synchronous>, transform_indices = @transform_4, window_bounds = array<i64: 1, 256>}, {pipeline_mode = #tpu.pipeline_mode<synchronous>, transform_indices = @transform_5, window_bounds = array<i64: 256, 128>}, {pipeline_mode = #tpu.pipeline_mode<synchronous>, transform_indices = @transform_6, window_bounds = array<i64: 1, 128>}, {pipeline_mode = #tpu.pipeline_mode<synchronous>, transform_indices = @transform_7, window_bounds = array<i64: 128, 128>}, {pipeline_mode = #tpu.pipeline_mode<synchronous>, transform_indices = @transform_8, window_bounds = array<i64: 1, 128>}, {transform_indices = @transform_9, window_bounds = array<i64: 256, 128>}]} {
    %c0 = arith.constant 0 : index
    %c0_0 = arith.constant 0 : index
    %0 = vector.load %arg1[%c0, %c0_0] : memref<256x5xf32, #tpu.memory_space<vmem>>, vector<256x5xf32>
    %1 = arith.truncf %0 : vector<256x5xf32> to vector<256x5xbf16>
    %c0_1 = arith.constant 0 : index
    %c0_2 = arith.constant 0 : index
    %2 = vector.load %arg2[%c0_1, %c0_2] : memref<5x512xbf16, #tpu.memory_space<vmem>>, vector<5x512xbf16>
    %cst = arith.constant dense<0.000000e+00> : vector<256x512xf32>
    %3 = tpu.matmul %1, %2, %cst {dimension_numbers = #tpu.dot_dimension_numbers<[1], [0], [0], [1], [0, 0, 1, 1], [], []>} : vector<256x5xbf16>, vector<5x512xbf16>, vector<256x512xf32> -> vector<256x512xf32>
    %c0_3 = arith.constant 0 : index
    %c0_4 = arith.constant 0 : index
    %4 = vector.load %arg3[%c0_3, %c0_4] : memref<1x512xf32, #tpu.memory_space<vmem>>, vector<1x512xf32>
    %5 = vector.broadcast %4 : vector<1x512xf32> to vector<256x512xf32>
    %6 = arith.addf %3, %5 : vector<256x512xf32>
    %cst_5 = arith.constant 0.000000e+00 : f32
    %7 = vector.broadcast %cst_5 : f32 to vector<256x512xf32>
    %8 = arith.maximumf %6, %7 : vector<256x512xf32>
    %9 = arith.truncf %8 : vector<256x512xf32> to vector<256x512xbf16>
    %c0_6 = arith.constant 0 : index
    %c0_7 = arith.constant 0 : index
    %10 = vector.load %arg4[%c0_6, %c0_7] : memref<512x256xbf16, #tpu.memory_space<vmem>>, vector<512x256xbf16>
    %cst_8 = arith.constant dense<0.000000e+00> : vector<256x256xf32>
    %11 = tpu.matmul %9, %10, %cst_8 {dimension_numbers = #tpu.dot_dimension_numbers<[1], [0], [0], [1], [0, 0, 1, 1], [], []>} : vector<256x512xbf16>, vector<512x256xbf16>, vector<256x256xf32> -> vector<256x256xf32>
    %c0_9 = arith.constant 0 : index
    %c0_10 = arith.constant 0 : index
    %12 = vector.load %arg5[%c0_9, %c0_10] : memref<1x256xf32, #tpu.memory_space<vmem>>, vector<1x256xf32>
    %13 = vector.broadcast %12 : vector<1x256xf32> to vector<256x256xf32>
    %14 = arith.addf %11, %13 : vector<256x256xf32>
    %cst_11 = arith.constant 0.000000e+00 : f32
    %15 = vector.broadcast %cst_11 : f32 to vector<256x256xf32>
    %16 = arith.maximumf %14, %15 : vector<256x256xf32>
    %17 = arith.truncf %16 : vector<256x256xf32> to vector<256x256xbf16>
    %c0_12 = arith.constant 0 : index
    %c0_13 = arith.constant 0 : index
    %18 = vector.load %arg6[%c0_12, %c0_13] : memref<256x128xbf16, #tpu.memory_space<vmem>>, vector<256x128xbf16>
    %cst_14 = arith.constant dense<0.000000e+00> : vector<256x128xf32>
    %19 = tpu.matmul %17, %18, %cst_14 {dimension_numbers = #tpu.dot_dimension_numbers<[1], [0], [0], [1], [0, 0, 1, 1], [], []>} : vector<256x256xbf16>, vector<256x128xbf16>, vector<256x128xf32> -> vector<256x128xf32>
    %c0_15 = arith.constant 0 : index
    %c0_16 = arith.constant 0 : index
    %20 = vector.load %arg7[%c0_15, %c0_16] : memref<1x128xf32, #tpu.memory_space<vmem>>, vector<1x128xf32>
    %21 = vector.broadcast %20 : vector<1x128xf32> to vector<256x128xf32>
    %22 = arith.addf %19, %21 : vector<256x128xf32>
    %cst_17 = arith.constant 0.000000e+00 : f32
    %23 = vector.broadcast %cst_17 : f32 to vector<256x128xf32>
    %24 = arith.maximumf %22, %23 : vector<256x128xf32>
    %25 = arith.truncf %24 : vector<256x128xf32> to vector<256x128xbf16>
    %c0_18 = arith.constant 0 : index
    %c0_19 = arith.constant 0 : index
    %26 = vector.load %arg8[%c0_18, %c0_19] : memref<128x128xbf16, #tpu.memory_space<vmem>>, vector<128x128xbf16>
    %cst_20 = arith.constant dense<0.000000e+00> : vector<256x128xf32>
    %27 = tpu.matmul %25, %26, %cst_20 {dimension_numbers = #tpu.dot_dimension_numbers<[1], [0], [0], [1], [0, 0, 1, 1], [], []>} : vector<256x128xbf16>, vector<128x128xbf16>, vector<256x128xf32> -> vector<256x128xf32>
    %c0_21 = arith.constant 0 : index
    %c0_22 = arith.constant 0 : index
    %28 = vector.load %arg9[%c0_21, %c0_22] : memref<1x128xf32, #tpu.memory_space<vmem>>, vector<1x128xf32>
    %29 = vector.broadcast %28 : vector<1x128xf32> to vector<256x128xf32>
    %30 = arith.addf %27, %29 : vector<256x128xf32>
    %c0_23 = arith.constant 0 : index
    %c0_24 = arith.constant 0 : index
    %31 = vector.load %arg10[%c0_23, %c0_24] : memref<256x128xf32, #tpu.memory_space<vmem>>, vector<256x128xf32>
    tpu.vector_store %arg10[%c0_23, %c0_24], %30 {strides = array<i32>} : memref<256x128xf32, #tpu.memory_space<vmem>>, vector<256x128xf32>,
    return
  }
  func.func @transform_0(%arg0: i32) -> (i32, i32) {
    %c0_i32 = arith.constant 0 : i32
    %c0_i32_0 = arith.constant 0 : i32
    return %arg0, %c0_i32 : i32, i32
  }
  func.func @transform_1(%arg0: i32) -> (i32, i32) {
    %c0_i32 = arith.constant 0 : i32
    %c0_i32_0 = arith.constant 0 : i32
    %c0_i32_1 = arith.constant 0 : i32
    return %c0_i32, %c0_i32_0 : i32, i32
  }
  func.func @transform_2(%arg0: i32) -> (i32, i32) {
    %c0_i32 = arith.constant 0 : i32
    %c0_i32_0 = arith.constant 0 : i32
    %c0_i32_1 = arith.constant 0 : i32
    return %c0_i32, %c0_i32_0 : i32, i32
  }
  func.func @transform_3(%arg0: i32) -> (i32, i32) {
    %c0_i32 = arith.constant 0 : i32
    %c0_i32_0 = arith.constant 0 : i32
    %c0_i32_1 = arith.constant 0 : i32
    return %c0_i32, %c0_i32_0 : i32, i32
  }
  func.func @transform_4(%arg0: i32) -> (i32, i32) {
    %c0_i32 = arith.constant 0 : i32
    %c0_i32_0 = arith.constant 0 : i32
    %c0_i32_1 = arith.constant 0 : i32
    return %c0_i32, %c0_i32_0 : i32, i32
  }
  func.func @transform_5(%arg0: i32) -> (i32, i32) {
    %c0_i32 = arith.constant 0 : i32
    %c0_i32_0 = arith.constant 0 : i32
    %c0_i32_1 = arith.constant 0 : i32
    return %c0_i32, %c0_i32_0 : i32, i32
  }
  func.func @transform_6(%arg0: i32) -> (i32, i32) {
    %c0_i32 = arith.constant 0 : i32
    %c0_i32_0 = arith.constant 0 : i32
    %c0_i32_1 = arith.constant 0 : i32
    return %c0_i32, %c0_i32_0 : i32, i32
  }
  func.func @transform_7(%arg0: i32) -> (i32, i32) {
    %c0_i32 = arith.constant 0 : i32
    %c0_i32_0 = arith.constant 0 : i32
    %c0_i32_1 = arith.constant 0 : i32
    return %c0_i32, %c0_i32_0 : i32, i32
  }
  func.func @transform_8(%arg0: i32) -> (i32, i32) {
    %c0_i32 = arith.constant 0 : i32
    %c0_i32_0 = arith.constant 0 : i32
    %c0_i32_1 = arith.constant 0 : i32
    return %c0_i32, %c0_i32_0 : i32, i32
  }
  func.func @transform_9(%arg0: i32) -> (i32, i32) {
    %c0_i32 = arith.constant 0 : i32
    %c0_i32_0 = arith.constant 0 : i32
    return %arg0, %c0_i32 : i32, i32
  }
}

</mosaic_0001>

<bundles_post_ra>
// kernel: tpu_custom_call.1
= control target key start
LH: loop header
LB: loop body
LE: loop exit
PB: predicated region body
PF: predicated region fallthrough
CT: control target
= control target key end

     0   :  { %14 = vsyncpa [#allocation3], 0  ;;  %s3660_s0 = inlined_call_operand.vmem [shape: f32[256,5], index: 0, kind: input, shape index: {}]   ;;  %s3661_s1 = inlined_call_operand.vmem [shape: bf16[5,512], index: 1, kind: input, shape index: {}]   ;;  %s3662_s2 = inlined_call_operand.vmem [shape: f32[1,512], index: 2, kind: input, shape index: {}]   ;;  %s3663_s3 = inlined_call_operand.hbm [shape: bf16[512,256], index: 3, kind: input, shape index: {}]   ;;  %s3664_s4 = inlined_call_operand.vmem [shape: f32[1,256], index: 4, kind: input, shape index: {}]   ;;  %s3665_s5 = inlined_call_operand.vmem [shape: bf16[256,128], index: 5, kind: input, shape index: {}]   ;;  %s3666_s6 = inlined_call_operand.vmem [shape: f32[1,128], index: 6, kind: input, shape index: {}]   ;;  %s3667_s7 = inlined_call_operand.vmem [shape: bf16[128,128], index: 7, kind: input, shape index: {}]   ;;  %s3668_s8 = inlined_call_operand.vmem [shape: f32[1,128], index: 8, kind: input, shape index: {}]   ;;  %s3669_s9 = inlined_call_operand.hbm [shape: f32[256,128], index: 9, kind: output, shape index: {}]  }
   0x1   :  { %15 = vsyncpa [#allocation4], 0  ;;  %s2894_s30 = smov [#allocation2]   ;;  %s2846_s13 = scalar_lea.hbm %s3663_s3, 8192 }
   0x2   :  { %s27_s10 = sshll.u32 %s2894_s30, 4  ;;  %p2847_p0 = scmp.ne.s32.totalorder %s3663_s3, %s2846_s13  ;;  %s28_s10 = int_to_ptr.vmem [resolvable:$true] %s27_s10 }
   0x3   :  { %p2850_p1 = scmp.lt.u32.totalorder %s2846_s13, %s3663_s3 }
   0x5   :  { %p2852_p2 = pnand %p2850_p1, %p2847_p0 }
   0x7   :  { %2855 = shalt.err (!%p2852_p2)
}
   0x8   :  { %s2856_s18 = scalar_lea.vmem %s28_s10, 8192  ;;  %p2861_p4 = scmp.lt.s32.totalorder %s28_s10, %s28_s10 }
   0x9   :  { %p2857_p3 = scmp.ne.s32.totalorder %s28_s10, %s2856_s18  ;;  %p2862_p5 = scmp.lt.s32.totalorder %s2856_s18, %s2856_s18 }
   0xb   :  { %p2863_p6 = por %p2862_p5, %p2861_p4 }
   0xd   :  { %p2864_p7 = pnand %p2863_p6, %p2857_p3 }
   0xf   :  { %2867 = shalt.err (!%p2864_p7)
}
  0x10   :  { %s2895_s19 = smov 128   ;;  %s2896_s20 = smov 8  }
  0x11   :  { %33 = dma.hbm_to_vmem [thread:$0]  %s3663_s3, 8192, %s28_s10, [#allocation3], %s2895_s19, %s2895_s19, %s2896_s20  }
  0x12   :  { %2890 = dma.done.wait [#allocation3], 8192  }
  0x13   :  { %2891 = vsyncadd [#allocation3], 4294959104  ;;  %vm179_vm0 = vcmask 1041408   ;;  %v2897_v0 = vmov 0   ;;  %vm180_vm1 = vcmask 1042432   ;;  %v2898_v1 = vmov 65535  }
  0x14   :  { %227 = vmatprep.mubr.bf16.mxu0 %v2897_v0  ;;  %347 = vmatprep.mubr.bf16.mxu1 %v2897_v0  ;;  %v181_v2 = vsel %vm179_vm0, 4294967295, %v2898_v1  ;;  %v96_v3 = vld [vmem:[%s3661_s1] sm:$0x77]  ;;  %v49_v8 = vld [vmem:[%s3660_s0 + $0x8] sm:$0xff]  ;;  %vm130_vm2 = vcmask 39936   ;;  %v50_v16 = vld [vmem:[%s3660_s0 + $0x10] sm:$0xff] }
  0x15   :  { %v182_v4 = vsel %vm180_vm1, %v181_v2, 0  ;;  %v2277_v5 = vcombine.high %v96_v3, %v96_v3  ;;  %v2276_v6 = vcombine.low %v96_v3, %v96_v3  ;;  %v48_v7 = vld [vmem:[%s3660_s0] sm:$0xff]  ;;  %v73_v13 = vld [vmem:[%s3660_s0 + $0xc8] sm:$0xff]  ;;  %v51_v17 = vld [vmem:[%s3660_s0 + $0x18] sm:$0xff] }
  0x16   :  { %v2976_v11 = vpack.c.bf16 %v49_v8, %v48_v7  ;;  %v72_v12 = vld [vmem:[%s3660_s0 + $0xc0] sm:$0xff]  ;;  %v97_v15 = vld [vmem:[%s3661_s1 + $0x8] sm:$0x77]  ;;  %v74_v20 = vld [vmem:[%s3660_s0 + $0xd0] sm:$0xff]  ;;  %v3007_v26 = vpack.c.bf16 %v51_v17, %v50_v16 }
  0x17   :  { %v187_v9 = vand.u32 %v2277_v5, %v182_v4  ;;  %v184_v10 = vand.u32 %v2276_v6, %v182_v4  ;;  %v2986_v14 = vpack.c.bf16 %v73_v13, %v72_v12  ;;  %v2278_v18 = vcombine.low %v97_v15, %v97_v15  ;;  %v75_v21 = vld [vmem:[%s3660_s0 + $0xd8] sm:$0xff]  ;;  %v2731_v27 = vld [vmem:[#allocation2 + $0x14] ss:$8 sps:$4 sm:$0xff]   ;;  %v2729_v29 = vld [vmem:[#allocation2 + $0x10] ss:$8 sps:$4 sm:$0xff]  }
  0x18   :  { %v2279_v19 = vcombine.high %v97_v15, %v97_v15  ;;  %v2726_v24 = vld [vmem:[#allocation2] ss:$8 sps:$4 sm:$0xff]   ;;  %v2728_v25 = vld [vmem:[#allocation2 + $0x4] ss:$8 sps:$4 sm:$0xff]   ;;  %v3009_v28 = vpack.c.bf16 %v75_v21, %v74_v20  ;;  %v52_v31 = vld [vmem:[%s3660_s0 + $0x20] sm:$0xff] }
  0x19   :  { %195 = vmatprep.subr.bf16.mxu0 %v187_v9  ;;  %2586 = vmatprep.subr.bf16.mxu1 %v187_v9  ;;  %v190_v23 = vand.u32 %v2278_v18, %v182_v4  ;;  %v2734_v30 = vld [vmem:[#allocation2 + $0x24] ss:$8 sps:$4 sm:$0xff]   ;;  %v53_v32 = vld [vmem:[%s3660_s0 + $0x28] sm:$0xff]  ;;  %v76_v33 = vld [vmem:[%s3660_s0 + $0xe0] sm:$0xff] }
  0x1a   :  { %196 = vmatpush1.bf16.msra.mxu0 %v184_v10  ;;  %2587 = vmatpush1.bf16.msra.mxu1 %v184_v10  ;;  %v193_v22 = vand.u32 %v2279_v19, %v182_v4  ;;  %v2732_v34 = vld [vmem:[#allocation2 + $0x20] ss:$8 sps:$4 sm:$0xff]   ;;  %v77_v35 = vld [vmem:[%s3660_s0 + $0xe8] sm:$0xff]  ;;  %v3029_v37 = vpack.c.bf16 %v53_v32, %v52_v31  ;;  %v2740_v40 = vld [vmem:[#allocation2 + $0x44] ss:$8 sps:$4 sm:$0xff]  }
  0x1b   :  { %1169 = vmatprep.subr.bf16.mxu0 %v2728_v25  ;;  %v2737_v36 = vld [vmem:[#allocation2 + $0x34] ss:$8 sps:$4 sm:$0xff]   ;;  %v3031_v38 = vpack.c.bf16 %v77_v35, %v76_v33  ;;  %v2735_v39 = vld [vmem:[#allocation2 + $0x30] ss:$8 sps:$4 sm:$0xff]   ;;  %v54_v41 = vld [vmem:[%s3660_s0 + $0x30] sm:$0xff] }
  0x1c   :  { %388 = vmatprep.subr.bf16.mxu1 %v193_v22  ;;  %v55_v42 = vld [vmem:[%s3660_s0 + $0x38] sm:$0xff]  ;;  %v78_v43 = vld [vmem:[%s3660_s0 + $0xf0] sm:$0xff]  ;;  %v2743_v46 = vld [vmem:[#allocation2 + $0x54] ss:$8 sps:$4 sm:$0xff]  }
  0x1d   :  { %2280 = vmatmul.mubr.msk.bf16.vlgmr.msra.gmra.mrb[0].mxu0 %vm130_vm2, %v2976_v11  ;;  %2292 = vmatmul.mubr.msk.bf16.vlgmr.msra.gmra.mrb[0].mxu1 %vm130_vm2, %v2986_v14  ;;  %v2738_v44 = vld [vmem:[#allocation2 + $0x40] ss:$8 sps:$4 sm:$0xff]   ;;  %v3051_v47 = vpack.c.bf16 %v55_v42, %v54_v41  ;;  %v2741_v49 = vld [vmem:[#allocation2 + $0x50] ss:$8 sps:$4 sm:$0xff]   ;;  %v2746_v50 = vld [vmem:[#allocation2 + $0x64] ss:$8 sps:$4 sm:$0xff]  }
  0x1e   :  { %237 = vmatprep.mubr.bf16.mxu0 %v2897_v0  ;;  %357 = vmatprep.mubr.bf16.mxu1 %v2897_v0  ;;  %v79_v45 = vld [vmem:[%s3660_s0 + $0xf8] sm:$0xff]  ;;  %v56_v51 = vld [vmem:[%s3660_s0 + $0x40] sm:$0xff]  ;;  %v57_v52 = vld [vmem:[%s3660_s0 + $0x48] sm:$0xff] }
  0x1f   :  { %389 = vmatpush1.bf16.msra.mxu1 %v190_v23  ;;  %1170 = vmatpush1.bf16.msra.mxu0 %v2726_v24  ;;  %v3053_v48 = vpack.c.bf16 %v79_v45, %v78_v43  ;;  %v2744_v53 = vld [vmem:[#allocation2 + $0x60] ss:$8 sps:$4 sm:$0xff]   ;;  %v2749_v54 = vld [vmem:[#allocation2 + $0x74] ss:$8 sps:$4 sm:$0xff]   ;;  %v3067_v55 = vpack.c.bf16 %v57_v52, %v56_v51  ;;  %v2747_v56 = vld [vmem:[#allocation2 + $0x70] ss:$8 sps:$4 sm:$0xff]  }
  0x20   :  { %1171 = vmatprep.subr.bf16.mxu0 %v2731_v27  ;;  %v2752_v57 = vld [vmem:[#allocation2 + $0x84] ss:$8 sps:$4 sm:$0xff]   ;;  %v2750_v60 = vld [vmem:[#allocation2 + $0x80] ss:$8 sps:$4 sm:$0xff]   ;;  %v2755_v61 = vld [vmem:[#allocation2 + $0x94] ss:$8 sps:$4 sm:$0xff]  }
  0x21   :  { %v58_v58 = vld [vmem:[%s3660_s0 + $0x50] sm:$0xff]  ;;  %v59_v59 = vld [vmem:[%s3660_s0 + $0x58] sm:$0xff]  ;;  %v2753_v63 = vld [vmem:[#allocation2 + $0x90] ss:$8 sps:$4 sm:$0xff]  }
  0x22   :  { %v85_v62 = vpack.c.bf16 %v59_v59, %v58_v58  ;;  %v2758_v1 = vld [vmem:[#allocation2 + $0xa4] ss:$8 sps:$4 sm:$0xff]   ;;  %v60_v2 = vld [vmem:[%s3660_s0 + $0x60] sm:$0xff]  ;;  %v61_v3 = vld [vmem:[%s3660_s0 + $0x68] sm:$0xff] }
  0x23   :  { %1172 = vmatpush1.bf16.msra.mxu0 %v2729_v29  ;;  %v2756_v4 = vld [vmem:[#allocation2 + $0xa0] ss:$8 sps:$4 sm:$0xff]   ;;  %v2761_v5 = vld [vmem:[#allocation2 + $0xb4] ss:$8 sps:$4 sm:$0xff]   ;;  %v86_v6 = vpack.c.bf16 %v61_v3, %v60_v2  ;;  %v2759_v7 = vld [vmem:[#allocation2 + $0xb0] ss:$8 sps:$4 sm:$0xff]  }
  0x24   :  { %1173 = vmatprep.subr.bf16.mxu0 %v2734_v30  ;;  %v2764_v8 = vld [vmem:[#allocation2 + $0xc4] ss:$8 sps:$4 sm:$0xff]   ;;  %v2767_v12 = vld [vmem:[#allocation2 + $0xd4] ss:$8 sps:$4 sm:$0xff]   ;;  %v2765_v15 = vld [vmem:[#allocation2 + $0xd0] ss:$8 sps:$4 sm:$0xff]  }
  0x25   :  { %2281 = vmatmul.mubr.msk.bf16.gmra.mrb[4].mxu0 %vm130_vm2, %v3007_v26  ;;  %2293 = vmatmul.mubr.msk.bf16.gmra.mrb[4].mxu1 %vm130_vm2, %v3009_v28  ;;  %v62_v9 = vld [vmem:[%s3660_s0 + $0x70] sm:$0xff]  ;;  %v63_v10 = vld [vmem:[%s3660_s0 + $0x78] sm:$0xff]  ;;  %v64_v17 = vld [vmem:[%s3660_s0 + $0x80] sm:$0xff] }
  0x26   :  { %247 = vmatprep.mubr.bf16.mxu0 %v2897_v0  ;;  %367 = vmatprep.mubr.bf16.mxu1 %v2897_v0  ;;  %v87_v13 = vpack.c.bf16 %v63_v10, %v62_v9  ;;  %v2770_v16 = vld [vmem:[#allocation2 + $0xe4] ss:$8 sps:$4 sm:$0xff]   ;;  %v65_v18 = vld [vmem:[%s3660_s0 + $0x88] sm:$0xff]  ;;  %v2768_v19 = vld [vmem:[#allocation2 + $0xe0] ss:$8 sps:$4 sm:$0xff]  }
  0x27   :  { %1174 = vmatpush1.bf16.msra.mxu0 %v2732_v34  ;;  %v88_v20 = vpack.c.bf16 %v65_v18, %v64_v17  ;;  %v66_v21 = vld [vmem:[%s3660_s0 + $0x90] sm:$0xff]  ;;  %v67_v22 = vld [vmem:[%s3660_s0 + $0x98] sm:$0xff]  ;;  %v68_v24 = vld [vmem:[%s3660_s0 + $0xa0] sm:$0xff]  ;;  %v100_v34 = vlaneseq }
  0x28   :  { %1175 = vmatprep.subr.bf16.mxu0 %v2737_v36  ;;  %v89_v23 = vpack.c.bf16 %v67_v22, %v66_v21  ;;  %v69_v25 = vld [vmem:[%s3660_s0 + $0xa8] sm:$0xff]  ;;  %v70_v27 = vld [vmem:[%s3660_s0 + $0xb0] sm:$0xff]  ;;  %v71_v29 = vld [vmem:[%s3660_s0 + $0xb8] sm:$0xff] }
  0x29   :  { %v91_v30 = vpack.c.bf16 %v71_v29, %v70_v27  ;;  %v2773_v31 = vld [vmem:[#allocation2 + $0xf4] ss:$8 sps:$4 sm:$0xff]   ;;  %v2771_v32 = vld [vmem:[#allocation2 + $0xf0] ss:$8 sps:$4 sm:$0xff]   ;;  %v2776_v33 = vld [vmem:[#allocation2 + $0x104] ss:$8 sps:$4 sm:$0xff]  }
  0x2a   :  { %v3167_v35 = vshrl.u32 %v100_v34, 7  ;;  %v3173_v36 = vld [vmem:[%s3662_s2] sm:$0xf]  ;;  %v2782_v22 = vld [vmem:[#allocation2 + $0x124] ss:$8 sps:$4 sm:$0xff]  }
  0x2b   :  { %1176 = vmatpush1.bf16.msra.mxu0 %v2735_v39  ;;  %v2777_v17 = vld [vmem:[#allocation2 + $0x110] ss:$8 sps:$4 sm:$0xff]  }
  0x2c   :  { %1177 = vmatprep.subr.bf16.mxu0 %v2740_v40 }
  0x2d   :  { %2282 = vmatmul.mubr.msk.bf16.gmra.mrb[8].mxu0 %vm130_vm2, %v3029_v37  ;;  %2294 = vmatmul.mubr.msk.bf16.gmra.mrb[8].mxu1 %vm130_vm2, %v3031_v38 }
  0x2e   :  { %257 = vmatprep.mubr.bf16.mxu0 %v2897_v0  ;;  %377 = vmatprep.mubr.bf16.mxu1 %v2897_v0 }
  0x2f   :  { %1178 = vmatpush1.bf16.msra.mxu0 %v2738_v44 }
  0x30   :  { %1179 = vmatprep.subr.bf16.mxu0 %v2743_v46 }
  0x33   :  { %1180 = vmatpush1.bf16.msra.mxu0 %v2741_v49 }
  0x34   :  { %1181 = vmatprep.subr.bf16.mxu0 %v2746_v50 }
  0x35   :  { %2283 = vmatmul.mubr.msk.bf16.gmra.mrb[12].mxu0 %vm130_vm2, %v3051_v47  ;;  %2295 = vmatmul.mubr.msk.bf16.gmra.mrb[12].mxu1 %vm130_vm2, %v3053_v48 }
  0x36   :  { %267 = vmatprep.mubr.bf16.mxu0 %v2897_v0  ;;  %420 = vmatprep.mubr.bf16.mxu1 %v2897_v0 }
  0x37   :  { %1182 = vmatpush1.bf16.msra.mxu0 %v2744_v53 }
  0x38   :  { %1183 = vmatprep.subr.bf16.mxu0 %v2749_v54 }
  0x3b   :  { %1184 = vmatpush1.bf16.msra.mxu0 %v2747_v56 }
  0x3c   :  { %1185 = vmatprep.subr.bf16.mxu0 %v2752_v57 }
  0x3d   :  { %2284 = vmatmul.mubr.msk.bf16.gmra.mrb[16].mxu0 %vm130_vm2, %v3067_v55  ;;  %2296 = vmatmul.mubr.msk.bf16.vlgmr.msra.gmra.mrb[16].mxu1 %vm130_vm2, %v2976_v11  ;;  %v2762_v11 = vld [vmem:[#allocation2 + $0xc0] ss:$8 sps:$4 sm:$0xff]  }
  0x3e   :  { %277 = vmatprep.mubr.bf16.mxu0 %v2897_v0  ;;  %430 = vmatprep.mubr.bf16.mxu1 %v2897_v0 }
  0x3f   :  { %1186 = vmatpush1.bf16.msra.mxu0 %v2750_v60 }
  0x40   :  { %1187 = vmatprep.subr.bf16.mxu0 %v2755_v61 }
  0x43   :  { %1188 = vmatpush1.bf16.msra.mxu0 %v2753_v63 }
  0x44   :  { %1189 = vmatprep.subr.bf16.mxu0 %v2758_v1  ;;  %v2774_v1 = vld [vmem:[#allocation2 + $0x100] ss:$8 sps:$4 sm:$0xff]  }
  0x45   :  { %2285 = vmatmul.mubr.msk.bf16.gmra.mrb[20].mxu0 %vm130_vm2, %v85_v62  ;;  %2297 = vmatmul.mubr.msk.bf16.gmra.mrb[20].mxu1 %vm130_vm2, %v3007_v26  ;;  %v90_v26 = vpack.c.bf16 %v69_v25, %v68_v24 }
  0x46   :  { %287 = vmatprep.mubr.bf16.mxu0 %v2897_v0  ;;  %440 = vmatprep.mubr.bf16.mxu1 %v2897_v0 }
  0x47   :  { %1190 = vmatpush1.bf16.msra.mxu0 %v2756_v4 }
  0x48   :  { %1191 = vmatprep.subr.bf16.mxu0 %v2761_v5  ;;  %v2779_v5 = vld [vmem:[#allocation2 + $0x114] ss:$8 sps:$4 sm:$0xff]  }
  0x4b   :  { %1192 = vmatpush1.bf16.msra.mxu0 %v2759_v7 }
  0x4c   :  { %1193 = vmatprep.subr.bf16.mxu0 %v2764_v8 }
  0x4d   :  { %2286 = vmatmul.mubr.msk.bf16.gmra.mrb[24].mxu0 %vm130_vm2, %v86_v6  ;;  %2298 = vmatmul.mubr.msk.bf16.gmra.mrb[24].mxu1 %vm130_vm2, %v3029_v37 }
  0x4e   :  { %297 = vmatprep.mubr.bf16.mxu0 %v2897_v0  ;;  %450 = vmatprep.mubr.bf16.mxu1 %v2897_v0 }
  0x4f   :  { %1194 = vmatpush1.bf16.msra.mxu0 %v2762_v11 }
  0x50   :  { %1195 = vmatprep.subr.bf16.mxu0 %v2767_v12 }
  0x53   :  { %1196 = vmatpush1.bf16.msra.mxu0 %v2765_v15 }
  0x54   :  { %1197 = vmatprep.subr.bf16.mxu0 %v2770_v16 }
  0x55   :  { %2287 = vmatmul.mubr.msk.bf16.gmra.mrb[28].mxu0 %vm130_vm2, %v87_v13  ;;  %2299 = vmatmul.mubr.msk.bf16.gmra.mrb[28].mxu1 %vm130_vm2, %v3051_v47 }
  0x56   :  { %307 = vmatprep.mubr.bf16.mxu0 %v2897_v0  ;;  %460 = vmatprep.mubr.bf16.mxu1 %v2897_v0 }
  0x57   :  { %1198 = vmatpush1.bf16.msra.mxu0 %v2768_v19 }
  0x58   :  { %1199 = vmatprep.subr.bf16.mxu0 %v2773_v31 }
  0x5b   :  { %1200 = vmatpush1.bf16.msra.mxu0 %v2771_v32 }
  0x5c   :  { %1362 = vmatprep.subr.bf16.mxu0 %v2776_v33 }
  0x5d   :  { %2288 = vmatmul.mubr.msk.bf16.gmra.mrb[32].mxu0 %vm130_vm2, %v88_v20  ;;  %2300 = vmatmul.mubr.msk.bf16.gmra.mrb[32].mxu1 %vm130_vm2, %v3067_v55 }
  0x5e   :  { %317 = vmatprep.mubr.bf16.mxu0 %v2897_v0  ;;  %470 = vmatprep.mubr.bf16.mxu1 %v2897_v0 }
  0x65   :  { %2289 = vmatmul.mubr.msk.bf16.gmra.mrb[36].mxu0 %vm130_vm2, %v89_v23  ;;  %2301 = vmatmul.mubr.msk.bf16.gmra.mrb[36].mxu1 %vm130_vm2, %v85_v62 }
  0x66   :  { %327 = vmatprep.mubr.bf16.mxu0 %v2897_v0  ;;  %480 = vmatprep.mubr.bf16.mxu1 %v2897_v0 }
  0x6d   :  { %2290 = vmatmul.mubr.msk.bf16.gmra.mrb[40].mxu0 %vm130_vm2, %v90_v26  ;;  %2302 = vmatmul.mubr.msk.bf16.gmra.mrb[40].mxu1 %vm130_vm2, %v86_v6 }
  0x6e   :  { %337 = vmatprep.mubr.bf16.mxu0 %v2897_v0  ;;  %490 = vmatprep.mubr.bf16.mxu1 %v2897_v0 }
  0x75   :  { %2291 = vmatmul.mubr.msk.bf16.gmra.mrb[44].mxu0 %vm130_vm2, %v91_v30  ;;  %2303 = vmatmul.mubr.msk.bf16.gmra.mrb[44].mxu1 %vm130_vm2, %v87_v13 }
  0x76   :  { %500 = vmatprep.mubr.bf16.mxu1 %v2897_v0 }
  0x7d   :  { %2304 = vmatmul.mubr.msk.bf16.gmra.mrb[48].mxu1 %vm130_vm2, %v88_v20 }
  0x7e   :  { %510 = vmatprep.mubr.bf16.mxu1 %v2897_v0 }
  0x85   :  { %2305 = vmatmul.mubr.msk.bf16.gmra.mrb[52].mxu1 %vm130_vm2, %v89_v23 }
  0x86   :  { %520 = vmatprep.mubr.bf16.mxu1 %v2897_v0 }
  0x8d   :  { %2306 = vmatmul.mubr.msk.bf16.gmra.mrb[56].mxu1 %vm130_vm2, %v90_v26 }
  0x8e   :  { %530 = vmatprep.mubr.bf16.mxu1 %v2897_v0 }
  0x95   :  { %2307 = vmatmul.mubr.msk.bf16.gmra.mrb[60].mxu1 %vm130_vm2, %v91_v30 }
  0x96   :  { %540 = vmatprep.mubr.bf16.mxu1 %v2897_v0 }
  0x9d   :  { %2308 = vmatmul.mubr.msk.bf16.gmra.mrb[64].mxu1 %vm130_vm2, %v2986_v14  ;;  %v102_v14 = vsub.s32 0, %v3167_v35 }
  0x9e   :  { %550 = vmatprep.mubr.bf16.mxu1 %v2897_v0 }
  0x9f   :  { %v3179_v37 = vrot.slane %v3173_v36, %v102_v14 }
  0xa5   :  { %2309 = vmatmul.mubr.msk.bf16.gmra.mrb[68].mxu1 %vm130_vm2, %v3009_v28  ;;  %v106_v28 = vsub.s32 1, %v3167_v35 }
  0xa6   :  { %560 = vmatprep.mubr.bf16.mxu1 %v2897_v0 }
  0xad   :  { %2310 = vmatmul.mubr.msk.bf16.gmra.mrb[72].mxu1 %vm130_vm2, %v3031_v38 }
  0xae   :  { %570 = vmatprep.mubr.bf16.mxu1 %v2897_v0  ;;  %v3184_v0 = vrot.slane %v3173_v36, %v106_v28 }
  0xb5   :  { %2311 = vmatmul.mubr.msk.bf16.gmra.mrb[76].mxu1 %vm130_vm2, %v3053_v48 }
  0xf0   :  { %v229_v38 = vpop.f32.mrb[0].mxu0  ;;  %v349_v43 = vpop.f32.mrb[0].mxu1 }
  0xf1   :  { %v230_v39 = vadd.f32 %v229_v38, %v3179_v37  ;;  %v231_v40 = vpop.f32.mrb[1].mxu0  ;;  %v350_v46 = vadd.f32 %v349_v43, %v3179_v37  ;;  %v351_v47 = vpop.f32.mrb[1].mxu1  ;;  %v2780_v38 = vld [vmem:[#allocation2 + $0x120] ss:$8 sps:$4 sm:$0xff]  }
  0xf2   :  { %v232_v41 = vadd.f32 %v231_v40, %v3184_v0  ;;  %v233_v42 = vpop.f32.mrb[2].mxu0  ;;  %v352_v49 = vadd.f32 %v351_v47, %v3184_v0  ;;  %v353_v50 = vpop.f32.mrb[2].mxu1 }
  0xf3   :  { %v234_v44 = vadd.f32 %v233_v42, %v3179_v37  ;;  %v235_v45 = vpop.f32.mrb[3].mxu0  ;;  %v581_v51 = vmax.f32 %v230_v39, 0.0  ;;  %v677_v53 = vmax.f32 %v350_v46, 0.0  ;;  %v354_v54 = vadd.f32 %v353_v50, %v3179_v37  ;;  %v355_v55 = vpop.f32.mrb[3].mxu1  ;;  %v2785_v42 = vld [vmem:[#allocation2 + $0x134] ss:$8 sps:$4 sm:$0xff]  }
  0xf4   :  { %v236_v48 = vadd.f32 %v235_v45, %v3184_v0  ;;  %v582_v56 = vmax.f32 %v232_v41, 0.0  ;;  %v678_v58 = vmax.f32 %v352_v49, 0.0  ;;  %v356_v59 = vadd.f32 %v355_v55, %v3184_v0 }
  0xf5   :  { %v585_v52 = vmax.f32 %v234_v44, 0.0  ;;  %v681_v61 = vmax.f32 %v354_v54, 0.0 }
  0xf6   :  { %v586_v57 = vmax.f32 %v236_v48, 0.0  ;;  %v682_v2 = vmax.f32 %v356_v59, 0.0 }
  0xf7   :  { %v709_v60 = vpack.c.bf16 %v585_v52, %v581_v51  ;;  %v3195_v6 = vpack.c.bf16 %v681_v61, %v677_v53  ;;  %v2783_v53 = vld [vmem:[#allocation2 + $0x130] ss:$8 sps:$4 sm:$0xff]  }
  0xf8   :  { %v710_v62 = vpack.c.bf16 %v586_v57, %v582_v56  ;;  %v239_v63 = vpop.f32.mrb[4].mxu0  ;;  %v3198_v9 = vpack.c.bf16 %v682_v2, %v678_v58  ;;  %v359_v10 = vpop.f32.mrb[4].mxu1  ;;  %v2788_v58 = vld [vmem:[#allocation2 + $0x144] ss:$8 sps:$4 sm:$0xff]  }
  0xf9   :  { %v240_v3 = vadd.f32 %v239_v63, %v3179_v37  ;;  %v241_v4 = vpop.f32.mrb[5].mxu0  ;;  %v360_v13 = vadd.f32 %v359_v10, %v3179_v37  ;;  %v361_v15 = vpop.f32.mrb[5].mxu1 }
  0xfa   :  { %v242_v7 = vadd.f32 %v241_v4, %v3184_v0  ;;  %v243_v8 = vpop.f32.mrb[6].mxu0  ;;  %1201 = vmatprep.mubr.bf16.mxu0 %v710_v62  ;;  %v362_v18 = vadd.f32 %v361_v15, %v3184_v0  ;;  %v363_v19 = vpop.f32.mrb[6].mxu1 }
  0xfb   :  { %v244_v11 = vadd.f32 %v243_v8, %v3179_v37  ;;  %v245_v12 = vpop.f32.mrb[7].mxu0  ;;  %1202 = vmatmul.mubr.bf16.vlgmr.msra.gmra.mrb[48].mxu0 %v709_v60  ;;  %v589_v20 = vmax.f32 %v240_v3, 0.0  ;;  %v685_v23 = vmax.f32 %v360_v13, 0.0  ;;  %v364_v24 = vadd.f32 %v363_v19, %v3179_v37  ;;  %v365_v25 = vpop.f32.mrb[7].mxu1  ;;  %v2786_v8 = vld [vmem:[#allocation2 + $0x140] ss:$8 sps:$4 sm:$0xff]  }
  0xfc   :  { %v246_v16 = vadd.f32 %v245_v12, %v3184_v0  ;;  %1363 = vmatpush1.bf16.msra.mxu0 %v2774_v1  ;;  %v590_v26 = vmax.f32 %v242_v7, 0.0  ;;  %v686_v29 = vmax.f32 %v362_v18, 0.0  ;;  %v366_v30 = vadd.f32 %v365_v25, %v3184_v0  ;;  %v2791_v13 = vld [vmem:[#allocation2 + $0x154] ss:$8 sps:$4 sm:$0xff]  }
  0xfd   :  { %v593_v21 = vmax.f32 %v244_v11, 0.0  ;;  %1364 = vmatprep.subr.bf16.mxu0 %v2779_v5  ;;  %v689_v32 = vmax.f32 %v364_v24, 0.0  ;;  %v110_v24 = vsub.s32 2, %v3167_v35 }
  0xfe   :  { %v594_v27 = vmax.f32 %v246_v16, 0.0  ;;  %v690_v39 = vmax.f32 %v366_v30, 0.0  ;;  %v114_v30 = vsub.s32 3, %v3167_v35 }
  0xff   :  { %v713_v31 = vpack.c.bf16 %v593_v21, %v589_v20  ;;  %v3207_v43 = vpack.c.bf16 %v689_v32, %v685_v23 }
 0x100   :  { %v714_v33 = vpack.c.bf16 %v594_v27, %v590_v26  ;;  %v249_v34 = vpop.f32.mrb[8].mxu0  ;;  %1365 = vmatpush1.bf16.msra.mxu0 %v2777_v17  ;;  %v3210_v46 = vpack.c.bf16 %v690_v39, %v686_v29  ;;  %v369_v47 = vpop.f32.mrb[8].mxu1  ;;  %v2789_v26 = vld [vmem:[#allocation2 + $0x150] ss:$8 sps:$4 sm:$0xff]  }
 0x101   :  { %v250_v40 = vadd.f32 %v249_v34, %v3179_v37  ;;  %v251_v41 = vpop.f32.mrb[9].mxu0  ;;  %1366 = vmatprep.subr.bf16.mxu0 %v2782_v22  ;;  %v370_v50 = vadd.f32 %v369_v47, %v3179_v37  ;;  %v371_v51 = vpop.f32.mrb[9].mxu1 }
 0x102   :  { %v252_v44 = vadd.f32 %v251_v41, %v3184_v0  ;;  %v253_v45 = vpop.f32.mrb[10].mxu0  ;;  %1211 = vmatprep.mubr.bf16.mxu0 %v714_v33  ;;  %v372_v54 = vadd.f32 %v371_v51, %v3184_v0  ;;  %v373_v55 = vpop.f32.mrb[10].mxu1  ;;  %v2794_v33 = vld [vmem:[#allocation2 + $0x164] ss:$8 sps:$4 sm:$0xff]   ;;  %v2792_v51 = vld [vmem:[#allocation2 + $0x160] ss:$8 sps:$4 sm:$0xff]  }
 0x103   :  { %v254_v48 = vadd.f32 %v253_v45, %v3179_v37  ;;  %v255_v49 = vpop.f32.mrb[11].mxu0  ;;  %1212 = vmatmul.mubr.bf16.gmra.mrb[52].mxu0 %v713_v31  ;;  %v597_v56 = vmax.f32 %v250_v40, 0.0  ;;  %v693_v59 = vmax.f32 %v370_v50, 0.0  ;;  %v374_v60 = vadd.f32 %v373_v55, %v3179_v37  ;;  %v375_v61 = vpop.f32.mrb[11].mxu1 }
 0x104   :  { %v256_v52 = vadd.f32 %v255_v49, %v3184_v0  ;;  %1367 = vmatpush1.bf16.msra.mxu0 %v2780_v38  ;;  %v598_v62 = vmax.f32 %v252_v44, 0.0  ;;  %v694_v1 = vmax.f32 %v372_v54, 0.0  ;;  %v376_v2 = vadd.f32 %v375_v61, %v3184_v0 }
 0x105   :  { %v601_v57 = vmax.f32 %v254_v48, 0.0  ;;  %1368 = vmatprep.subr.bf16.mxu0 %v2785_v42  ;;  %v697_v4 = vmax.f32 %v374_v60, 0.0  ;;  %v3233_v48 = vrot.slane %v3173_v36, %v110_v24 }
 0x106   :  { %v602_v63 = vmax.f32 %v256_v52, 0.0  ;;  %v698_v10 = vmax.f32 %v376_v2, 0.0 }
 0x107   :  { %v717_v3 = vpack.c.bf16 %v601_v57, %v597_v56  ;;  %v3219_v15 = vpack.c.bf16 %v697_v4, %v693_v59  ;;  %v2797_v56 = vld [vmem:[#allocation2 + $0x174] ss:$8 sps:$4 sm:$0xff]  }
 0x108   :  { %v718_v5 = vpack.c.bf16 %v602_v63, %v598_v62  ;;  %v259_v7 = vpop.f32.mrb[12].mxu0  ;;  %1369 = vmatpush1.bf16.msra.mxu0 %v2783_v53  ;;  %v3222_v18 = vpack.c.bf16 %v698_v10, %v694_v1  ;;  %v379_v19 = vpop.f32.mrb[12].mxu1  ;;  %v3236_v53 = vrot.slane %v3173_v36, %v114_v30  ;;  %v2800_v10 = vld [vmem:[#allocation2 + $0x184] ss:$8 sps:$4 sm:$0xff]   ;;  %v2803_v30 = vld [vmem:[#allocation2 + $0x194] ss:$8 sps:$4 sm:$0xff]  }
 0x109   :  { %v260_v11 = vadd.f32 %v259_v7, %v3179_v37  ;;  %v261_v12 = vpop.f32.mrb[13].mxu0  ;;  %1370 = vmatprep.subr.bf16.mxu0 %v2788_v58  ;;  %v380_v22 = vadd.f32 %v379_v19, %v3179_v37  ;;  %v381_v23 = vpop.f32.mrb[13].mxu1 }
 0x10a   :  { %v262_v16 = vadd.f32 %v261_v12, %v3184_v0  ;;  %v263_v17 = vpop.f32.mrb[14].mxu0  ;;  %1221 = vmatprep.mubr.bf16.mxu0 %v718_v5  ;;  %v382_v27 = vadd.f32 %v381_v23, %v3184_v0  ;;  %v383_v29 = vpop.f32.mrb[14].mxu1 }
 0x10b   :  { %v264_v20 = vadd.f32 %v263_v17, %v3179_v37  ;;  %v265_v21 = vpop.f32.mrb[15].mxu0  ;;  %1222 = vmatmul.mubr.bf16.gmra.mrb[56].mxu0 %v717_v3  ;;  %v605_v31 = vmax.f32 %v260_v11, 0.0  ;;  %v701_v34 = vmax.f32 %v380_v22, 0.0  ;;  %v384_v38 = vadd.f32 %v383_v29, %v3179_v37  ;;  %v385_v39 = vpop.f32.mrb[15].mxu1  ;;  %v2795_v3 = vld [vmem:[#allocation2 + $0x170] ss:$8 sps:$4 sm:$0xff]  }
 0x10c   :  { %v266_v25 = vadd.f32 %v265_v21, %v3184_v0  ;;  %1371 = vmatpush1.bf16.msra.mxu0 %v2786_v8  ;;  %v606_v40 = vmax.f32 %v262_v16, 0.0  ;;  %v702_v42 = vmax.f32 %v382_v27, 0.0  ;;  %v386_v44 = vadd.f32 %v385_v39, %v3184_v0 }
 0x10d   :  { %v609_v32 = vmax.f32 %v264_v20, 0.0  ;;  %1372 = vmatprep.subr.bf16.mxu0 %v2791_v13  ;;  %v705_v47 = vmax.f32 %v384_v38, 0.0 }
 0x10e   :  { %v610_v41 = vmax.f32 %v266_v25, 0.0  ;;  %v706_v52 = vmax.f32 %v386_v44, 0.0  ;;  %v2798_v25 = vld [vmem:[#allocation2 + $0x180] ss:$8 sps:$4 sm:$0xff]  }
 0x10f   :  { %v721_v45 = vpack.c.bf16 %v609_v32, %v605_v31  ;;  %v3239_v57 = vpack.c.bf16 %v705_v47, %v701_v34 }
 0x110   :  { %v722_v49 = vpack.c.bf16 %v610_v41, %v606_v40  ;;  %v269_v50 = vpop.f32.mrb[16].mxu0  ;;  %1373 = vmatpush1.bf16.msra.mxu0 %v2789_v26  ;;  %v3242_v60 = vpack.c.bf16 %v706_v52, %v702_v42  ;;  %v422_v61 = vpop.f32.mrb[16].mxu1  ;;  %v2806_v52 = vld [vmem:[#allocation2 + $0x1a4] ss:$8 sps:$4 sm:$0xff]  }
 0x111   :  { %v270_v54 = vadd.f32 %v269_v50, %v3179_v37  ;;  %v271_v55 = vpop.f32.mrb[17].mxu0  ;;  %1374 = vmatprep.subr.bf16.mxu0 %v2794_v33  ;;  %v423_v36 = vadd.f32 %v422_v61, %v3233_v48  ;;  %v424_v1 = vpop.f32.mrb[17].mxu1 }
 0x112   :  { %v272_v58 = vadd.f32 %v271_v55, %v3184_v0  ;;  %v273_v59 = vpop.f32.mrb[18].mxu0  ;;  %1231 = vmatprep.mubr.bf16.mxu0 %v722_v49  ;;  %v425_v4 = vadd.f32 %v424_v1, %v3236_v53  ;;  %v426_v5 = vpop.f32.mrb[18].mxu1 }
 0x113   :  { %v274_v62 = vadd.f32 %v273_v59, %v3179_v37  ;;  %v275_v63 = vpop.f32.mrb[19].mxu0  ;;  %1232 = vmatmul.mubr.bf16.gmra.mrb[60].mxu0 %v721_v45  ;;  %v613_v7 = vmax.f32 %v270_v54, 0.0  ;;  %v583_v11 = vmax.f32 %v423_v36, 0.0  ;;  %v427_v12 = vadd.f32 %v426_v5, %v3233_v48  ;;  %v428_v13 = vpop.f32.mrb[19].mxu1  ;;  %v2801_v45 = vld [vmem:[#allocation2 + $0x190] ss:$8 sps:$4 sm:$0xff]  }
 0x114   :  { %v276_v2 = vadd.f32 %v275_v63, %v3184_v0  ;;  %1375 = vmatpush1.bf16.msra.mxu0 %v2792_v51  ;;  %v614_v16 = vmax.f32 %v272_v58, 0.0  ;;  %v584_v19 = vmax.f32 %v425_v4, 0.0  ;;  %v429_v20 = vadd.f32 %v428_v13, %v3236_v53 }
 0x115   :  { %v617_v8 = vmax.f32 %v274_v62, 0.0  ;;  %1376 = vmatprep.subr.bf16.mxu0 %v2797_v56  ;;  %v587_v22 = vmax.f32 %v427_v12, 0.0 }
 0x116   :  { %v618_v17 = vmax.f32 %v276_v2, 0.0  ;;  %v588_v26 = vmax.f32 %v429_v20, 0.0 }
 0x117   :  { %v725_v21 = vpack.c.bf16 %v617_v8, %v613_v7  ;;  %v3251_v31 = vpack.c.bf16 %v587_v22, %v583_v11  ;;  %v2809_v8 = vld [vmem:[#allocation2 + $0x1b4] ss:$8 sps:$4 sm:$0xff]  }
 0x118   :  { %v726_v23 = vpack.c.bf16 %v618_v17, %v614_v16  ;;  %v279_v24 = vpop.f32.mrb[20].mxu0  ;;  %1377 = vmatpush1.bf16.msra.mxu0 %v2795_v3  ;;  %v3254_v34 = vpack.c.bf16 %v588_v26, %v584_v19  ;;  %v432_v38 = vpop.f32.mrb[20].mxu1  ;;  %v2804_v3 = vld [vmem:[#allocation2 + $0x1a0] ss:$8 sps:$4 sm:$0xff]  }
 0x119   :  { %v280_v27 = vadd.f32 %v279_v24, %v3179_v37  ;;  %v281_v29 = vpop.f32.mrb[21].mxu0  ;;  %1378 = vmatprep.subr.bf16.mxu0 %v2800_v10  ;;  %v433_v41 = vadd.f32 %v432_v38, %v3233_v48  ;;  %v434_v42 = vpop.f32.mrb[21].mxu1 }
 0x11a   :  { %v282_v32 = vadd.f32 %v281_v29, %v3184_v0  ;;  %v283_v33 = vpop.f32.mrb[22].mxu0  ;;  %1241 = vmatprep.mubr.bf16.mxu0 %v726_v23  ;;  %v435_v47 = vadd.f32 %v434_v42, %v3236_v53  ;;  %v436_v49 = vpop.f32.mrb[22].mxu1  ;;  %v2807_v23 = vld [vmem:[#allocation2 + $0x1b0] ss:$8 sps:$4 sm:$0xff]   ;;  %v2812_v29 = vld [vmem:[#allocation2 + $0x1c4] ss:$8 sps:$4 sm:$0xff]  }
 0x11b   :  { %v284_v39 = vadd.f32 %v283_v33, %v3179_v37  ;;  %v285_v40 = vpop.f32.mrb[23].mxu0  ;;  %1242 = vmatmul.mubr.bf16.gmra.mrb[64].mxu0 %v725_v21  ;;  %v621_v50 = vmax.f32 %v280_v27, 0.0  ;;  %v591_v54 = vmax.f32 %v433_v41, 0.0  ;;  %v437_v55 = vadd.f32 %v436_v49, %v3233_v48  ;;  %v438_v56 = vpop.f32.mrb[23].mxu1  ;;  %v2810_v49 = vld [vmem:[#allocation2 + $0x1c0] ss:$8 sps:$4 sm:$0xff]  }
 0x11c   :  { %v286_v44 = vadd.f32 %v285_v40, %v3184_v0  ;;  %1379 = vmatpush1.bf16.msra.mxu0 %v2798_v25  ;;  %v622_v58 = vmax.f32 %v282_v32, 0.0  ;;  %v592_v61 = vmax.f32 %v435_v47, 0.0  ;;  %v439_v62 = vadd.f32 %v438_v56, %v3236_v53 }
 0x11d   :  { %v625_v51 = vmax.f32 %v284_v39, 0.0  ;;  %1380 = vmatprep.subr.bf16.mxu0 %v2803_v30  ;;  %v595_v36 = vmax.f32 %v437_v55, 0.0 }
 0x11e   :  { %v626_v59 = vmax.f32 %v286_v44, 0.0  ;;  %v596_v4 = vmax.f32 %v439_v62, 0.0 }
 0x11f   :  { %v729_v63 = vpack.c.bf16 %v625_v51, %v621_v50  ;;  %v3263_v10 = vpack.c.bf16 %v595_v36, %v591_v54  ;;  %v2815_v54 = vld [vmem:[#allocation2 + $0x1d4] ss:$8 sps:$4 sm:$0xff]  }
 0x120   :  { %v730_v1 = vpack.c.bf16 %v626_v59, %v622_v58  ;;  %v289_v2 = vpop.f32.mrb[24].mxu0  ;;  %1381 = vmatpush1.bf16.msra.mxu0 %v2801_v45  ;;  %v3266_v13 = vpack.c.bf16 %v596_v4, %v592_v61  ;;  %v442_v16 = vpop.f32.mrb[24].mxu1 }
 0x121   :  { %v290_v5 = vadd.f32 %v289_v2, %v3179_v37  ;;  %v291_v7 = vpop.f32.mrb[25].mxu0  ;;  %1382 = vmatprep.subr.bf16.mxu0 %v2806_v52  ;;  %v443_v20 = vadd.f32 %v442_v16, %v3233_v48  ;;  %v444_v21 = vpop.f32.mrb[25].mxu1 }
 0x122   :  { %v292_v11 = vadd.f32 %v291_v7, %v3184_v0  ;;  %v293_v12 = vpop.f32.mrb[26].mxu0  ;;  %1251 = vmatprep.mubr.bf16.mxu0 %v730_v1  ;;  %v445_v24 = vadd.f32 %v444_v21, %v3236_v53  ;;  %v446_v25 = vpop.f32.mrb[26].mxu1 }
 0x123   :  { %v294_v17 = vadd.f32 %v293_v12, %v3179_v37  ;;  %v295_v19 = vpop.f32.mrb[27].mxu0  ;;  %1252 = vmatmul.mubr.bf16.gmra.mrb[68].mxu0 %v729_v63  ;;  %v629_v26 = vmax.f32 %v290_v5, 0.0  ;;  %v599_v30 = vmax.f32 %v443_v20, 0.0  ;;  %v447_v32 = vadd.f32 %v446_v25, %v3233_v48  ;;  %v448_v33 = vpop.f32.mrb[27].mxu1 }
 0x124   :  { %v296_v22 = vadd.f32 %v295_v19, %v3184_v0  ;;  %1383 = vmatpush1.bf16.msra.mxu0 %v2804_v3  ;;  %v630_v38 = vmax.f32 %v292_v11, 0.0  ;;  %v600_v40 = vmax.f32 %v445_v24, 0.0  ;;  %v449_v41 = vadd.f32 %v448_v33, %v3236_v53  ;;  %v2813_v3 = vld [vmem:[#allocation2 + $0x1d0] ss:$8 sps:$4 sm:$0xff]   ;;  %v2818_v11 = vld [vmem:[#allocation2 + $0x1e4] ss:$8 sps:$4 sm:$0xff]  }
 0x125   :  { %v633_v27 = vmax.f32 %v294_v17, 0.0  ;;  %1384 = vmatprep.subr.bf16.mxu0 %v2809_v8  ;;  %v603_v44 = vmax.f32 %v447_v32, 0.0  ;;  %v2821_v33 = vld [vmem:[#allocation2 + $0x1f4] ss:$8 sps:$4 sm:$0xff]  }
 0x126   :  { %v634_v39 = vmax.f32 %v296_v22, 0.0  ;;  %v604_v50 = vmax.f32 %v449_v41, 0.0 }
 0x127   :  { %v733_v42 = vpack.c.bf16 %v633_v27, %v629_v26  ;;  %v3275_v55 = vpack.c.bf16 %v603_v44, %v599_v30  ;;  %v2816_v27 = vld [vmem:[#allocation2 + $0x1e0] ss:$8 sps:$4 sm:$0xff]  }
 0x128   :  { %v734_v45 = vpack.c.bf16 %v634_v39, %v630_v38  ;;  %v299_v47 = vpop.f32.mrb[28].mxu0  ;;  %1385 = vmatpush1.bf16.msra.mxu0 %v2807_v23  ;;  %v3278_v59 = vpack.c.bf16 %v604_v50, %v600_v40  ;;  %v452_v61 = vpop.f32.mrb[28].mxu1 }
 0x129   :  { %v300_v51 = vadd.f32 %v299_v47, %v3179_v37  ;;  %v301_v52 = vpop.f32.mrb[29].mxu0  ;;  %1386 = vmatprep.subr.bf16.mxu0 %v2812_v29  ;;  %v453_v36 = vadd.f32 %v452_v61, %v3233_v48  ;;  %v454_v1 = vpop.f32.mrb[29].mxu1 }
 0x12a   :  { %v302_v56 = vadd.f32 %v301_v52, %v3184_v0  ;;  %v303_v58 = vpop.f32.mrb[30].mxu0  ;;  %1261 = vmatprep.mubr.bf16.mxu0 %v734_v45  ;;  %v455_v4 = vadd.f32 %v454_v1, %v3236_v53  ;;  %v456_v5 = vpop.f32.mrb[30].mxu1 }
 0x12b   :  { %v304_v62 = vadd.f32 %v303_v58, %v3179_v37  ;;  %v305_v63 = vpop.f32.mrb[31].mxu0  ;;  %1262 = vmatmul.mubr.bf16.gmra.mrb[72].mxu0 %v733_v42  ;;  %v637_v7 = vmax.f32 %v300_v51, 0.0  ;;  %v607_v12 = vmax.f32 %v453_v36, 0.0  ;;  %v457_v16 = vadd.f32 %v456_v5, %v3233_v48  ;;  %v458_v17 = vpop.f32.mrb[31].mxu1  ;;  %v2819_v51 = vld [vmem:[#allocation2 + $0x1f0] ss:$8 sps:$4 sm:$0xff]  }
 0x12c   :  { %v306_v2 = vadd.f32 %v305_v63, %v3184_v0  ;;  %1387 = vmatpush1.bf16.msra.mxu0 %v2810_v49  ;;  %v638_v19 = vmax.f32 %v302_v56, 0.0  ;;  %v608_v21 = vmax.f32 %v455_v4, 0.0  ;;  %v459_v22 = vadd.f32 %v458_v17, %v3236_v53 }
 0x12d   :  { %v641_v8 = vmax.f32 %v304_v62, 0.0  ;;  %1388 = vmatprep.subr.bf16.mxu0 %v2815_v54  ;;  %v611_v24 = vmax.f32 %v457_v16, 0.0 }
 0x12e   :  { %v642_v20 = vmax.f32 %v306_v2, 0.0  ;;  %v612_v29 = vmax.f32 %v459_v22, 0.0 }
 0x12f   :  { %v737_v23 = vpack.c.bf16 %v641_v8, %v637_v7  ;;  %v3287_v38 = vpack.c.bf16 %v611_v24, %v607_v12 }
 0x130   :  { %v738_v25 = vpack.c.bf16 %v642_v20, %v638_v19  ;;  %v309_v26 = vpop.f32.mrb[32].mxu0  ;;  %1389 = vmatpush1.bf16.msra.mxu0 %v2813_v3  ;;  %v3290_v41 = vpack.c.bf16 %v612_v29, %v608_v21  ;;  %v462_v42 = vpop.f32.mrb[32].mxu1 }
 0x131   :  { %v310_v30 = vadd.f32 %v309_v26, %v3179_v37  ;;  %v311_v32 = vpop.f32.mrb[33].mxu0  ;;  %1390 = vmatprep.subr.bf16.mxu0 %v2818_v11  ;;  %v463_v47 = vadd.f32 %v462_v42, %v3233_v48  ;;  %v464_v49 = vpop.f32.mrb[33].mxu1 }
 0x132   :  { %v312_v39 = vadd.f32 %v311_v32, %v3184_v0  ;;  %v313_v40 = vpop.f32.mrb[34].mxu0  ;;  %1271 = vmatprep.mubr.bf16.mxu0 %v738_v25  ;;  %v465_v52 = vadd.f32 %v464_v49, %v3236_v53  ;;  %v466_v54 = vpop.f32.mrb[34].mxu1 }
 0x133   :  { %v314_v44 = vadd.f32 %v313_v40, %v3179_v37  ;;  %v315_v45 = vpop.f32.mrb[35].mxu0  ;;  %1272 = vmatmul.mubr.bf16.gmra.mrb[76].mxu0 %v737_v23  ;;  %v645_v56 = vmax.f32 %v310_v30, 0.0  ;;  %v615_v61 = vmax.f32 %v463_v47, 0.0  ;;  %v467_v62 = vadd.f32 %v466_v54, %v3233_v48  ;;  %v468_v63 = vpop.f32.mrb[35].mxu1 }
 0x134   :  { %v316_v50 = vadd.f32 %v315_v45, %v3184_v0  ;;  %1391 = vmatpush1.bf16.msra.mxu0 %v2816_v27  ;;  %v646_v36 = vmax.f32 %v312_v39, 0.0  ;;  %v616_v2 = vmax.f32 %v465_v52, 0.0  ;;  %v469_v3 = vadd.f32 %v468_v63, %v3236_v53 }
 0x135   :  { %v649_v58 = vmax.f32 %v314_v44, 0.0  ;;  %1392 = vmatprep.subr.bf16.mxu0 %v2821_v33  ;;  %v619_v5 = vmax.f32 %v467_v62, 0.0 }
 0x136   :  { %v650_v1 = vmax.f32 %v316_v50, 0.0  ;;  %v620_v11 = vmax.f32 %v469_v3, 0.0 }
 0x137   :  { %v741_v4 = vpack.c.bf16 %v649_v58, %v645_v56  ;;  %v3299_v17 = vpack.c.bf16 %v619_v5, %v615_v61 }
 0x138   :  { %v742_v7 = vpack.c.bf16 %v650_v1, %v646_v36  ;;  %v319_v8 = vpop.f32.mrb[36].mxu0  ;;  %1393 = vmatpush1.bf16.msra.mxu0 %v2819_v51  ;;  %v3302_v21 = vpack.c.bf16 %v620_v11, %v616_v2  ;;  %v472_v22 = vpop.f32.mrb[36].mxu1 }
 0x139   :  { %v320_v12 = vadd.f32 %v319_v8, %v3179_v37  ;;  %v321_v16 = vpop.f32.mrb[37].mxu0  ;;  %v473_v25 = vadd.f32 %v472_v22, %v3233_v48  ;;  %v474_v26 = vpop.f32.mrb[37].mxu1 }
 0x13a   :  { %v322_v19 = vadd.f32 %v321_v16, %v3184_v0  ;;  %v323_v20 = vpop.f32.mrb[38].mxu0  ;;  %1281 = vmatprep.mubr.bf16.mxu0 %v742_v7  ;;  %v475_v29 = vadd.f32 %v474_v26, %v3236_v53  ;;  %v476_v30 = vpop.f32.mrb[38].mxu1 }
 0x13b   :  { %v324_v23 = vadd.f32 %v323_v20, %v3179_v37  ;;  %v325_v24 = vpop.f32.mrb[39].mxu0  ;;  %1282 = vmatmul.mubr.bf16.gmra.mrb[80].mxu0 %v741_v4  ;;  %v653_v32 = vmax.f32 %v320_v12, 0.0  ;;  %v623_v39 = vmax.f32 %v473_v25, 0.0  ;;  %v477_v40 = vadd.f32 %v476_v30, %v3233_v48  ;;  %v478_v42 = vpop.f32.mrb[39].mxu1 }
 0x13c   :  { %v326_v27 = vadd.f32 %v325_v24, %v3184_v0  ;;  %v654_v44 = vmax.f32 %v322_v19, 0.0  ;;  %v624_v47 = vmax.f32 %v475_v29, 0.0  ;;  %v479_v49 = vadd.f32 %v478_v42, %v3236_v53 }
 0x13d   :  { %v657_v33 = vmax.f32 %v324_v23, 0.0  ;;  %v627_v51 = vmax.f32 %v477_v40, 0.0 }
 0x13e   :  { %v658_v45 = vmax.f32 %v326_v27, 0.0  ;;  %v628_v56 = vmax.f32 %v479_v49, 0.0 }
 0x13f   :  { %v745_v50 = vpack.c.bf16 %v657_v33, %v653_v32  ;;  %v3311_v62 = vpack.c.bf16 %v627_v51, %v623_v39 }
 0x140   :  { %v746_v52 = vpack.c.bf16 %v658_v45, %v654_v44  ;;  %v329_v54 = vpop.f32.mrb[40].mxu0  ;;  %v3314_v1 = vpack.c.bf16 %v628_v56, %v624_v47  ;;  %v482_v2 = vpop.f32.mrb[40].mxu1 }
 0x141   :  { %v330_v58 = vadd.f32 %v329_v54, %v3179_v37  ;;  %v331_v61 = vpop.f32.mrb[41].mxu0  ;;  %v483_v5 = vadd.f32 %v482_v2, %v3233_v48  ;;  %v484_v7 = vpop.f32.mrb[41].mxu1 }
 0x142   :  { %v332_v63 = vadd.f32 %v331_v61, %v3184_v0  ;;  %v333_v36 = vpop.f32.mrb[42].mxu0  ;;  %1291 = vmatprep.mubr.bf16.mxu0 %v746_v52  ;;  %v485_v11 = vadd.f32 %v484_v7, %v3236_v53  ;;  %v486_v12 = vpop.f32.mrb[42].mxu1 }
 0x143   :  { %v334_v3 = vadd.f32 %v333_v36, %v3179_v37  ;;  %v335_v4 = vpop.f32.mrb[43].mxu0  ;;  %1292 = vmatmul.mubr.bf16.gmra.mrb[84].mxu0 %v745_v50  ;;  %v661_v16 = vmax.f32 %v330_v58, 0.0  ;;  %v631_v20 = vmax.f32 %v483_v5, 0.0  ;;  %v487_v22 = vadd.f32 %v486_v12, %v3233_v48  ;;  %v488_v23 = vpop.f32.mrb[43].mxu1 }
 0x144   :  { %v336_v8 = vadd.f32 %v335_v4, %v3184_v0  ;;  %v662_v24 = vmax.f32 %v332_v63, 0.0  ;;  %v632_v26 = vmax.f32 %v485_v11, 0.0  ;;  %v489_v27 = vadd.f32 %v488_v23, %v3236_v53 }
 0x145   :  { %v665_v19 = vmax.f32 %v334_v3, 0.0  ;;  %v635_v30 = vmax.f32 %v487_v22, 0.0 }
 0x146   :  { %v666_v25 = vmax.f32 %v336_v8, 0.0  ;;  %v636_v39 = vmax.f32 %v489_v27, 0.0 }
 0x147   :  { %v749_v29 = vpack.c.bf16 %v665_v19, %v661_v16  ;;  %v3323_v44 = vpack.c.bf16 %v635_v30, %v631_v20  ;;  %v2823_v30 = vld [vmem:[%s3665_s5] sm:$0xff]  }
 0x148   :  { %v750_v32 = vpack.c.bf16 %v666_v25, %v662_v24  ;;  %v339_v33 = vpop.f32.mrb[44].mxu0  ;;  %v3326_v49 = vpack.c.bf16 %v636_v39, %v632_v26  ;;  %v492_v50 = vpop.f32.mrb[44].mxu1 }
 0x149   :  { %v340_v40 = vadd.f32 %v339_v33, %v3179_v37  ;;  %v341_v42 = vpop.f32.mrb[45].mxu0  ;;  %v493_v54 = vadd.f32 %v492_v50, %v3233_v48  ;;  %v494_v56 = vpop.f32.mrb[45].mxu1 }
 0x14a   :  { %v342_v45 = vadd.f32 %v341_v42, %v3184_v0  ;;  %v343_v47 = vpop.f32.mrb[46].mxu0  ;;  %1301 = vmatprep.mubr.bf16.mxu0 %v750_v32  ;;  %v495_v61 = vadd.f32 %v494_v56, %v3236_v53  ;;  %v496_v63 = vpop.f32.mrb[46].mxu1 }
 0x14b   :  { %v344_v51 = vadd.f32 %v343_v47, %v3179_v37  ;;  %v345_v52 = vpop.f32.mrb[47].mxu0  ;;  %1302 = vmatmul.mubr.bf16.gmra.mrb[88].mxu0 %v749_v29  ;;  %v669_v36 = vmax.f32 %v340_v40, 0.0  ;;  %v639_v3 = vmax.f32 %v493_v54, 0.0  ;;  %v497_v4 = vadd.f32 %v496_v63, %v3233_v48  ;;  %v498_v5 = vpop.f32.mrb[47].mxu1  ;;  %v2822_v29 = vld [vmem:[%s3665_s5 + $0x40] sm:$0xff]  }
 0x14c   :  { %v346_v58 = vadd.f32 %v345_v52, %v3184_v0  ;;  %v670_v7 = vmax.f32 %v342_v45, 0.0  ;;  %v640_v11 = vmax.f32 %v495_v61, 0.0  ;;  %v499_v37 = vadd.f32 %v498_v5, %v3236_v53  ;;  %2402 = vmatprep.subr.bf16.mxu1 %v2822_v29 }
 0x14d   :  { %v673_v2 = vmax.f32 %v344_v51, 0.0  ;;  %v643_v16 = vmax.f32 %v497_v4, 0.0  ;;  %2403 = vmatpush3.bf16.msra.mxu1 %v2823_v30 }
 0x14e   :  { %v674_v8 = vmax.f32 %v346_v58, 0.0  ;;  %v644_v20 = vmax.f32 %v499_v37, 0.0 }
 0x14f   :  { %v753_v12 = vpack.c.bf16 %v673_v2, %v669_v36  ;;  %v3334_v22 = vpack.c.bf16 %v643_v16, %v639_v3  ;;  %v2824_v16 = vld [vmem:[%s3665_s5 + $0x48] sm:$0xff]  }
 0x150   :  { %v754_v19 = vpack.c.bf16 %v674_v8, %v670_v7  ;;  %v3336_v0 = vpack.c.bf16 %v644_v20, %v640_v11  ;;  %v502_v23 = vpop.f32.mrb[48].mxu1  ;;  %2404 = vmatprep.subr.bf16.mxu1 %v2824_v16 }
 0x151   :  { %v503_v24 = vadd.f32 %v502_v23, %v3233_v48  ;;  %v504_v25 = vpop.f32.mrb[49].mxu1 }
 0x152   :  { %1311 = vmatprep.mubr.bf16.mxu0 %v754_v19  ;;  %v505_v26 = vadd.f32 %v504_v25, %v3236_v53  ;;  %v506_v27 = vpop.f32.mrb[50].mxu1  ;;  %v2825_v19 = vld [vmem:[%s3665_s5 + $0x8] sm:$0xff]  }
 0x153   :  { %1312 = vmatmul.mubr.bf16.gmra.mrb[92].mxu0 %v753_v12  ;;  %v647_v32 = vmax.f32 %v503_v24, 0.0  ;;  %v507_v33 = vadd.f32 %v506_v27, %v3233_v48  ;;  %v508_v39 = vpop.f32.mrb[51].mxu1  ;;  %2405 = vmatpush3.bf16.msra.mxu1 %v2825_v19 }
 0x154   :  { %1321 = vmatprep.mubr.bf16.mxu0 %v3198_v9  ;;  %v648_v40 = vmax.f32 %v505_v26, 0.0  ;;  %v509_v42 = vadd.f32 %v508_v39, %v3236_v53 }
 0x155   :  { %v651_v9 = vmax.f32 %v507_v33, 0.0 }
 0x156   :  { %v652_v45 = vmax.f32 %v509_v42, 0.0 }
 0x157   :  { %v3349_v47 = vpack.c.bf16 %v651_v9, %v647_v32 }
 0x158   :  { %v3351_v50 = vpack.c.bf16 %v652_v45, %v648_v40  ;;  %v512_v51 = vpop.f32.mrb[52].mxu1 }
 0x159   :  { %v513_v52 = vadd.f32 %v512_v51, %v3233_v48  ;;  %v514_v54 = vpop.f32.mrb[53].mxu1 }
 0x15a   :  { %v515_v56 = vadd.f32 %v514_v54, %v3236_v53  ;;  %v516_v58 = vpop.f32.mrb[54].mxu1 }
 0x15b   :  { %1322 = vmatmul.mubr.bf16.gmra.mrb[96].mxu0 %v3195_v6  ;;  %v655_v61 = vmax.f32 %v513_v52, 0.0  ;;  %v517_v63 = vadd.f32 %v516_v58, %v3233_v48  ;;  %v518_v36 = vpop.f32.mrb[55].mxu1 }
 0x15c   :  { %1331 = vmatprep.mubr.bf16.mxu0 %v3210_v46  ;;  %v656_v2 = vmax.f32 %v515_v56, 0.0  ;;  %v519_v3 = vadd.f32 %v518_v36, %v3236_v53  ;;  %v2826_v36 = vld [vmem:[%s3665_s5 + $0x50] sm:$0xff]  }
 0x15d   :  { %v659_v4 = vmax.f32 %v517_v63, 0.0  ;;  %2406 = vmatprep.subr.bf16.mxu1 %v2826_v36  ;;  %v2836_v36 = vld [vmem:[%s3665_s5 + $0x78] sm:$0xff]  }
 0x15e   :  { %v660_v5 = vmax.f32 %v519_v3, 0.0  ;;  %v2828_v3 = vld [vmem:[%s3665_s5 + $0x58] sm:$0xff]  }
 0x15f   :  { %v3359_v7 = vpack.c.bf16 %v659_v4, %v655_v61 }
 0x160   :  { %v3361_v6 = vpack.c.bf16 %v660_v5, %v656_v2  ;;  %v522_v8 = vpop.f32.mrb[56].mxu1  ;;  %v2827_v2 = vld [vmem:[%s3665_s5 + $0x10] sm:$0xff]  }
 0x161   :  { %v523_v46 = vadd.f32 %v522_v8, %v3233_v48  ;;  %v524_v11 = vpop.f32.mrb[57].mxu1  ;;  %2407 = vmatpush3.bf16.msra.mxu1 %v2827_v2 }
 0x162   :  { %v525_v37 = vadd.f32 %v524_v11, %v3236_v53  ;;  %v526_v12 = vpop.f32.mrb[58].mxu1  ;;  %2408 = vmatprep.subr.bf16.mxu1 %v2828_v3 }
 0x163   :  { %1332 = vmatmul.mubr.bf16.gmra.mrb[100].mxu0 %v3207_v43  ;;  %v663_v20 = vmax.f32 %v523_v46, 0.0  ;;  %v527_v23 = vadd.f32 %v526_v12, %v3233_v48  ;;  %v528_v43 = vpop.f32.mrb[59].mxu1  ;;  %v2829_v12 = vld [vmem:[%s3665_s5 + $0x18] sm:$0xff]  }
 0x164   :  { %1341 = vmatprep.mubr.bf16.mxu0 %v3222_v18  ;;  %v664_v24 = vmax.f32 %v525_v37, 0.0  ;;  %v529_v25 = vadd.f32 %v528_v43, %v3236_v53 }
 0x165   :  { %v667_v18 = vmax.f32 %v527_v23, 0.0  ;;  %2409 = vmatpush3.bf16.msra.mxu1 %v2829_v12 }
 0x166   :  { %v668_v26 = vmax.f32 %v529_v25, 0.0 }
 0x167   :  { %v3375_v27 = vpack.c.bf16 %v667_v18, %v663_v20 }
 0x168   :  { %v3377_v29 = vpack.c.bf16 %v668_v26, %v664_v24  ;;  %v532_v30 = vpop.f32.mrb[60].mxu1  ;;  %v2831_v24 = vld [vmem:[%s3665_s5 + $0x20] sm:$0xff]   ;;  %v2832_v26 = vld [vmem:[%s3665_s5 + $0x68] sm:$0xff]  }
 0x169   :  { %v533_v32 = vadd.f32 %v532_v30, %v3233_v48  ;;  %v534_v33 = vpop.f32.mrb[61].mxu1 }
 0x16a   :  { %v535_v39 = vadd.f32 %v534_v33, %v3236_v53  ;;  %v536_v40 = vpop.f32.mrb[62].mxu1 }
 0x16b   :  { %1342 = vmatmul.mubr.bf16.gmra.mrb[104].mxu0 %v3219_v15  ;;  %v671_v42 = vmax.f32 %v533_v32, 0.0  ;;  %v537_v9 = vadd.f32 %v536_v40, %v3233_v48  ;;  %v538_v45 = vpop.f32.mrb[63].mxu1 }
 0x16c   :  { %1351 = vmatprep.mubr.bf16.mxu0 %v3242_v60  ;;  %v672_v51 = vmax.f32 %v535_v39, 0.0  ;;  %v539_v52 = vadd.f32 %v538_v45, %v3236_v53 }
 0x16d   :  { %v675_v54 = vmax.f32 %v537_v9, 0.0  ;;  %v2833_v9 = vld [vmem:[%s3665_s5 + $0x28] sm:$0xff]  }
 0x16e   :  { %v676_v56 = vmax.f32 %v539_v52, 0.0 }
 0x16f   :  { %v3385_v58 = vpack.c.bf16 %v675_v54, %v671_v42 }
 0x170   :  { %v3387_v15 = vpack.c.bf16 %v676_v56, %v672_v51  ;;  %v542_v61 = vpop.f32.mrb[64].mxu1 }
 0x171   :  { %v543_v60 = vadd.f32 %v542_v61, %v3233_v48  ;;  %v544_v63 = vpop.f32.mrb[65].mxu1  ;;  %v2835_v61 = vld [vmem:[%s3665_s5 + $0x30] sm:$0xff]  }
 0x172   :  { %v545_v4 = vadd.f32 %v544_v63, %v3236_v53 }
 0x173   :  { %1352 = vmatmul.mubr.bf16.gmra.mrb[108].mxu0 %v3239_v57  ;;  %v546_v57 = vpop.f32.mrb[66].mxu1  ;;  %v679_v5 = vmax.f32 %v543_v60, 0.0 }
 0x174   :  { %1394 = vmatprep.mubr.bf16.mxu0 %v3254_v34  ;;  %v547_v8 = vadd.f32 %v546_v57, %v3233_v48  ;;  %v548_v46 = vpop.f32.mrb[67].mxu1  ;;  %v680_v11 = vmax.f32 %v545_v4, 0.0  ;;  %v2830_v34 = vld [vmem:[%s3665_s5 + $0x60] sm:$0xff]  }
 0x175   :  { %v549_v37 = vadd.f32 %v548_v46, %v3236_v53  ;;  %2410 = vmatprep.subr.bf16.mxu1 %v2830_v34  ;;  %v2837_v46 = vld [vmem:[%s3665_s5 + $0x38] sm:$0xff]  }
 0x176   :  { %v683_v16 = vmax.f32 %v547_v8, 0.0  ;;  %2411 = vmatpush3.bf16.msra.mxu1 %v2831_v24 }
 0x177   :  { %v684_v19 = vmax.f32 %v549_v37, 0.0  ;;  %2412 = vmatprep.subr.bf16.mxu1 %v2832_v26 }
 0x178   :  { %v3410_v20 = vpack.c.bf16 %v683_v16, %v679_v5  ;;  %v552_v43 = vpop.f32.mrb[68].mxu1 }
 0x179   :  { %v3412_v23 = vpack.c.bf16 %v684_v19, %v680_v11  ;;  %v553_v25 = vadd.f32 %v552_v43, %v3233_v48  ;;  %v554_v18 = vpop.f32.mrb[69].mxu1 }
 0x17a   :  { %v555_v30 = vadd.f32 %v554_v18, %v3236_v53  ;;  %v556_v32 = vpop.f32.mrb[70].mxu1  ;;  %2413 = vmatpush3.bf16.msra.mxu1 %v2833_v9 }
 0x17b   :  { %1395 = vmatmul.mubr.bf16.vlgmr.msra.gmra.mrb[48].mxu0 %v3251_v31  ;;  %v687_v33 = vmax.f32 %v553_v25, 0.0  ;;  %v557_v39 = vadd.f32 %v556_v32, %v3233_v48  ;;  %v558_v40 = vpop.f32.mrb[71].mxu1 }
 0x17c   :  { %1404 = vmatprep.mubr.bf16.mxu0 %v3266_v13  ;;  %v688_v42 = vmax.f32 %v555_v30, 0.0  ;;  %v559_v31 = vadd.f32 %v558_v40, %v3236_v53  ;;  %v2834_v13 = vld [vmem:[%s3665_s5 + $0x70] sm:$0xff]  }
 0x17d   :  { %v691_v45 = vmax.f32 %v557_v39, 0.0  ;;  %2414 = vmatprep.subr.bf16.mxu1 %v2834_v13  ;;  %v2840_v13 = vld [vmem:[%s3667_s7 + $0x10] sm:$0xff]  }
 0x17e   :  { %v692_v51 = vmax.f32 %v559_v31, 0.0  ;;  %2415 = vmatpush3.bf16.msra.mxu1 %v2835_v61 }
 0x17f   :  { %v763_v52 = vpack.c.bf16 %v691_v45, %v687_v33  ;;  %2416 = vmatprep.subr.bf16.mxu1 %v2836_v36  ;;  %v2841_v36 = vld [vmem:[%s3667_s7 + $0x18] sm:$0xff]  }
 0x180   :  { %v764_v54 = vpack.c.bf16 %v692_v51, %v688_v42  ;;  %v562_v56 = vpop.f32.mrb[72].mxu1 }
 0x181   :  { %v563_v60 = vadd.f32 %v562_v56, %v3233_v48  ;;  %v564_v63 = vpop.f32.mrb[73].mxu1 }
 0x182   :  { %v565_v2 = vadd.f32 %v564_v63, %v3236_v53  ;;  %v566_v3 = vpop.f32.mrb[74].mxu1  ;;  %2417 = vmatpush3.bf16.msra.mxu1 %v2837_v46 }
 0x183   :  { %1405 = vmatmul.mubr.bf16.gmra.mrb[52].mxu0 %v3263_v10  ;;  %v695_v4 = vmax.f32 %v563_v60, 0.0  ;;  %v567_v57 = vadd.f32 %v566_v3, %v3233_v48  ;;  %v568_v5 = vpop.f32.mrb[75].mxu1 }
 0x184   :  { %1414 = vmatprep.mubr.bf16.mxu0 %v3278_v59  ;;  %v696_v8 = vmax.f32 %v565_v2, 0.0  ;;  %v569_v10 = vadd.f32 %v568_v5, %v3236_v53 }
 0x185   :  { %v699_v11 = vmax.f32 %v567_v57, 0.0 }
 0x186   :  { %v700_v37 = vmax.f32 %v569_v10, 0.0 }
 0x187   :  { %v767_v12 = vpack.c.bf16 %v699_v11, %v695_v4 }
 0x188   :  { %v768_v59 = vpack.c.bf16 %v700_v37, %v696_v8  ;;  %v572_v16 = vpop.f32.mrb[76].mxu1 }
 0x189   :  { %v573_v34 = vadd.f32 %v572_v16, %v3233_v48  ;;  %v574_v19 = vpop.f32.mrb[77].mxu1 }
 0x18a   :  { %v575_v43 = vadd.f32 %v574_v19, %v3236_v53  ;;  %v576_v24 = vpop.f32.mrb[78].mxu1 }
 0x18b   :  { %1415 = vmatmul.mubr.bf16.gmra.mrb[56].mxu0 %v3275_v55  ;;  %v703_v25 = vmax.f32 %v573_v34, 0.0  ;;  %v577_v18 = vadd.f32 %v576_v24, %v3233_v48  ;;  %v578_v26 = vpop.f32.mrb[79].mxu1  ;;  %v837_v48 = vld [vmem:[%s3664_s4] sm:$0x3] }
 0x18c   :  { %1424 = vmatprep.mubr.bf16.mxu0 %v3290_v41  ;;  %v704_v30 = vmax.f32 %v575_v43, 0.0  ;;  %v579_v32 = vadd.f32 %v578_v26, %v3236_v53  ;;  %v3477_v53 = vrot.slane %v837_v48, %v102_v14  ;;  %v3481_v55 = vrot.slane %v837_v48, %v106_v28 }
 0x18d   :  { %v707_v33 = vmax.f32 %v577_v18, 0.0 }
 0x18e   :  { %v708_v39 = vmax.f32 %v579_v32, 0.0 }
 0x18f   :  { %v771_v40 = vpack.c.bf16 %v707_v33, %v703_v25 }
 0x190   :  { %v772_v42 = vpack.c.bf16 %v708_v39, %v704_v30 }
 0x193   :  { %1425 = vmatmul.mubr.bf16.gmra.mrb[60].mxu0 %v3287_v38 }
 0x194   :  { %1434 = vmatprep.mubr.bf16.mxu0 %v3302_v21 }
 0x19b   :  { %1435 = vmatmul.mubr.bf16.gmra.mrb[64].mxu0 %v3299_v17 }
 0x19c   :  { %1444 = vmatprep.mubr.bf16.mxu0 %v3314_v1 }
 0x1a3   :  { %1445 = vmatmul.mubr.bf16.gmra.mrb[68].mxu0 %v3311_v62 }
 0x1a4   :  { %1454 = vmatprep.mubr.bf16.mxu0 %v3326_v49  ;;  %v2838_v49 = vld [vmem:[%s3667_s7] sm:$0xff]  }
 0x1a5   :  { %2538 = vmatprep.subr.bf16.mxu1 %v2838_v49 }
 0x1ab   :  { %1455 = vmatmul.mubr.bf16.gmra.mrb[72].mxu0 %v3323_v44 }
 0x1ac   :  { %1464 = vmatprep.mubr.bf16.mxu0 %v3336_v0 }
 0x1b3   :  { %1465 = vmatmul.mubr.bf16.gmra.mrb[76].mxu0 %v3334_v22 }
 0x1b4   :  { %1474 = vmatprep.mubr.bf16.mxu0 %v3351_v50 }
 0x1bb   :  { %1475 = vmatmul.mubr.bf16.gmra.mrb[80].mxu0 %v3349_v47 }
 0x1bc   :  { %1484 = vmatprep.mubr.bf16.mxu0 %v3361_v6 }
 0x1c3   :  { %1485 = vmatmul.mubr.bf16.gmra.mrb[84].mxu0 %v3359_v7 }
 0x1c4   :  { %1494 = vmatprep.mubr.bf16.mxu0 %v3377_v29  ;;  %v2839_v29 = vld [vmem:[%s3667_s7 + $0x8] sm:$0xff]  }
 0x1cb   :  { %1495 = vmatmul.mubr.bf16.gmra.mrb[88].mxu0 %v3375_v27 }
 0x1cc   :  { %1504 = vmatprep.mubr.bf16.mxu0 %v3387_v15 }
 0x1d3   :  { %1505 = vmatmul.mubr.bf16.gmra.mrb[92].mxu0 %v3385_v58 }
 0x1d4   :  { %1514 = vmatprep.mubr.bf16.mxu0 %v3412_v23 }
 0x1db   :  { %1515 = vmatmul.mubr.bf16.gmra.mrb[96].mxu0 %v3410_v20 }
 0x1dc   :  { %1524 = vmatprep.mubr.bf16.mxu0 %v764_v54 }
 0x1e3   :  { %1525 = vmatmul.mubr.bf16.gmra.mrb[100].mxu0 %v763_v52 }
 0x1e4   :  { %1534 = vmatprep.mubr.bf16.mxu0 %v768_v59 }
 0x1eb   :  { %1535 = vmatmul.mubr.bf16.gmra.mrb[104].mxu0 %v767_v12 }
 0x1ec   :  { %1544 = vmatprep.mubr.bf16.mxu0 %v772_v42 }
 0x1f3   :  { %1545 = vmatmul.mubr.bf16.gmra.mrb[108].mxu0 %v771_v40 }
 0x24e   :  { %v1396_v38 = vpop.f32.mrb[48].mxu0 }
 0x24f   :  { %v2588_v41 = vadd.f32 %v1396_v38, %v3477_v53  ;;  %v1398_v17 = vpop.f32.mrb[49].mxu0 }
 0x250   :  { %v2589_v21 = vadd.f32 %v1398_v17, %v3481_v55  ;;  %v1400_v62 = vpop.f32.mrb[50].mxu0 }
 0x251   :  { %v2590_v1 = vadd.f32 %v1400_v62, %v3477_v53  ;;  %v1402_v44 = vpop.f32.mrb[51].mxu0  ;;  %v1555_v22 = vmax.f32 %v2588_v41, 0.0 }
 0x252   :  { %v2591_v14 = vadd.f32 %v1402_v44, %v3481_v55  ;;  %v1556_v28 = vmax.f32 %v2589_v21, 0.0 }
 0x253   :  { %v1557_v35 = vmax.f32 %v2590_v1, 0.0 }
 0x254   :  { %v1558_v0 = vmax.f32 %v2591_v14, 0.0 }
 0x255   :  { %v1619_v47 = vpack.c.bf16 %v1557_v35, %v1555_v22 }
 0x256   :  { %v1620_v50 = vpack.c.bf16 %v1558_v0, %v1556_v28  ;;  %v1406_v7 = vpop.f32.mrb[52].mxu0 }
 0x257   :  { %v2592_v6 = vadd.f32 %v1406_v7, %v3477_v53  ;;  %v1408_v27 = vpop.f32.mrb[53].mxu0 }
 0x258   :  { %v2593_v58 = vadd.f32 %v1408_v27, %v3481_v55  ;;  %v1410_v15 = vpop.f32.mrb[54].mxu0  ;;  %1818 = vmatprep.mubr.bf16.mxu1 %v1620_v50 }
 0x259   :  { %v2594_v20 = vadd.f32 %v1410_v15, %v3477_v53  ;;  %v1412_v23 = vpop.f32.mrb[55].mxu0  ;;  %1819 = vmatmul.mubr.bf16.vlgmr.msra.gmra.mrb[80].mxu1 %v1619_v47  ;;  %v1559_v9 = vmax.f32 %v2592_v6, 0.0 }
 0x25a   :  { %v2595_v31 = vadd.f32 %v1412_v23, %v3481_v55  ;;  %2539 = vmatpush3.bf16.msra.mxu1 %v2838_v49  ;;  %v1560_v51 = vmax.f32 %v2593_v58, 0.0 }
 0x25b   :  { %v1561_v45 = vmax.f32 %v2594_v20, 0.0  ;;  %2540 = vmatprep.subr.bf16.mxu1 %v2839_v29 }
 0x25c   :  { %v1562_v52 = vmax.f32 %v2595_v31, 0.0 }
 0x25d   :  { %v1621_v54 = vpack.c.bf16 %v1561_v45, %v1559_v9 }
 0x25e   :  { %v1622_v56 = vpack.c.bf16 %v1562_v52, %v1560_v51  ;;  %v1416_v61 = vpop.f32.mrb[56].mxu0  ;;  %2541 = vmatpush3.bf16.msra.mxu1 %v2839_v29 }
 0x25f   :  { %v2596_v60 = vadd.f32 %v1416_v61, %v3477_v53  ;;  %v1418_v63 = vpop.f32.mrb[57].mxu0  ;;  %2542 = vmatprep.subr.bf16.mxu1 %v2840_v13 }
 0x260   :  { %v2597_v2 = vadd.f32 %v1418_v63, %v3481_v55  ;;  %v1420_v3 = vpop.f32.mrb[58].mxu0  ;;  %1826 = vmatprep.mubr.bf16.mxu1 %v1622_v56 }
 0x261   :  { %v2598_v4 = vadd.f32 %v1420_v3, %v3477_v53  ;;  %v1422_v57 = vpop.f32.mrb[59].mxu0  ;;  %1827 = vmatmul.mubr.bf16.gmra.mrb[84].mxu1 %v1621_v54  ;;  %v1563_v8 = vmax.f32 %v2596_v60, 0.0 }
 0x262   :  { %v2599_v5 = vadd.f32 %v1422_v57, %v3481_v55  ;;  %2543 = vmatpush3.bf16.msra.mxu1 %v2840_v13  ;;  %v1564_v46 = vmax.f32 %v2597_v2, 0.0 }
 0x263   :  { %v1565_v10 = vmax.f32 %v2598_v4, 0.0  ;;  %2544 = vmatprep.subr.bf16.mxu1 %v2841_v36 }
 0x264   :  { %v1566_v11 = vmax.f32 %v2599_v5, 0.0 }
 0x265   :  { %v1623_v37 = vpack.c.bf16 %v1565_v10, %v1563_v8 }
 0x266   :  { %v1624_v12 = vpack.c.bf16 %v1566_v11, %v1564_v46  ;;  %v1426_v59 = vpop.f32.mrb[60].mxu0  ;;  %2545 = vmatpush3.bf16.msra.mxu1 %v2841_v36 }
 0x267   :  { %v2600_v16 = vadd.f32 %v1426_v59, %v3477_v53  ;;  %v1428_v34 = vpop.f32.mrb[61].mxu0 }
 0x268   :  { %v2601_v19 = vadd.f32 %v1428_v34, %v3481_v55  ;;  %v1430_v43 = vpop.f32.mrb[62].mxu0  ;;  %1834 = vmatprep.mubr.bf16.mxu1 %v1624_v12 }
 0x269   :  { %v2602_v24 = vadd.f32 %v1430_v43, %v3477_v53  ;;  %v1432_v25 = vpop.f32.mrb[63].mxu0  ;;  %1835 = vmatmul.mubr.bf16.gmra.mrb[88].mxu1 %v1623_v37  ;;  %v1567_v26 = vmax.f32 %v2600_v16, 0.0 }
 0x26a   :  { %v2603_v18 = vadd.f32 %v1432_v25, %v3481_v55  ;;  %v1568_v32 = vmax.f32 %v2601_v19, 0.0 }
 0x26b   :  { %v1569_v30 = vmax.f32 %v2602_v24, 0.0 }
 0x26c   :  { %v1570_v33 = vmax.f32 %v2603_v18, 0.0 }
 0x26d   :  { %v1625_v39 = vpack.c.bf16 %v1569_v30, %v1567_v26 }
 0x26e   :  { %v1626_v40 = vpack.c.bf16 %v1570_v33, %v1568_v32  ;;  %v1436_v42 = vpop.f32.mrb[64].mxu0 }
 0x26f   :  { %v2604_v48 = vadd.f32 %v1436_v42, %v3477_v53  ;;  %v1438_v38 = vpop.f32.mrb[65].mxu0 }
 0x270   :  { %v2605_v41 = vadd.f32 %v1438_v38, %v3481_v55  ;;  %v1440_v17 = vpop.f32.mrb[66].mxu0  ;;  %1842 = vmatprep.mubr.bf16.mxu1 %v1626_v40 }
 0x271   :  { %v2606_v21 = vadd.f32 %v1440_v17, %v3477_v53  ;;  %v1442_v62 = vpop.f32.mrb[67].mxu0  ;;  %1843 = vmatmul.mubr.bf16.gmra.mrb[92].mxu1 %v1625_v39  ;;  %v1571_v44 = vmax.f32 %v2604_v48, 0.0 }
 0x272   :  { %v2607_v1 = vadd.f32 %v1442_v62, %v3481_v55  ;;  %v1572_v14 = vmax.f32 %v2605_v41, 0.0 }
 0x273   :  { %v1573_v49 = vmax.f32 %v2606_v21, 0.0 }
 0x274   :  { %v1574_v22 = vmax.f32 %v2607_v1, 0.0 }
 0x275   :  { %v1627_v35 = vpack.c.bf16 %v1573_v49, %v1571_v44 }
 0x276   :  { %v1628_v28 = vpack.c.bf16 %v1574_v22, %v1572_v14  ;;  %v1446_v0 = vpop.f32.mrb[68].mxu0 }
 0x277   :  { %v2608_v47 = vadd.f32 %v1446_v0, %v3477_v53  ;;  %v1448_v50 = vpop.f32.mrb[69].mxu0 }
 0x278   :  { %v2609_v7 = vadd.f32 %v1448_v50, %v3481_v55  ;;  %v1450_v6 = vpop.f32.mrb[70].mxu0  ;;  %1850 = vmatprep.mubr.bf16.mxu1 %v1628_v28 }
 0x279   :  { %v2610_v27 = vadd.f32 %v1450_v6, %v3477_v53  ;;  %v1452_v29 = vpop.f32.mrb[71].mxu0  ;;  %1851 = vmatmul.mubr.bf16.gmra.mrb[96].mxu1 %v1627_v35  ;;  %v1575_v15 = vmax.f32 %v2608_v47, 0.0 }
 0x27a   :  { %v2611_v58 = vadd.f32 %v1452_v29, %v3481_v55  ;;  %v1576_v23 = vmax.f32 %v2609_v7, 0.0 }
 0x27b   :  { %v1577_v20 = vmax.f32 %v2610_v27, 0.0 }
 0x27c   :  { %v1578_v31 = vmax.f32 %v2611_v58, 0.0 }
 0x27d   :  { %v1629_v9 = vpack.c.bf16 %v1577_v20, %v1575_v15 }
 0x27e   :  { %v1630_v45 = vpack.c.bf16 %v1578_v31, %v1576_v23  ;;  %v1456_v13 = vpop.f32.mrb[72].mxu0 }
 0x27f   :  { %v2612_v51 = vadd.f32 %v1456_v13, %v3477_v53  ;;  %v1458_v52 = vpop.f32.mrb[73].mxu0 }
 0x280   :  { %v2613_v54 = vadd.f32 %v1458_v52, %v3481_v55  ;;  %v1460_v56 = vpop.f32.mrb[74].mxu0  ;;  %1858 = vmatprep.mubr.bf16.mxu1 %v1630_v45 }
 0x281   :  { %v2614_v61 = vadd.f32 %v1460_v56, %v3477_v53  ;;  %v1462_v60 = vpop.f32.mrb[75].mxu0  ;;  %1859 = vmatmul.mubr.bf16.gmra.mrb[100].mxu1 %v1629_v9  ;;  %v1579_v36 = vmax.f32 %v2612_v51, 0.0 }
 0x282   :  { %v2615_v63 = vadd.f32 %v1462_v60, %v3481_v55  ;;  %v1580_v3 = vmax.f32 %v2613_v54, 0.0 }
 0x283   :  { %v1581_v2 = vmax.f32 %v2614_v61, 0.0 }
 0x284   :  { %v1582_v4 = vmax.f32 %v2615_v63, 0.0 }
 0x285   :  { %v1631_v57 = vpack.c.bf16 %v1581_v2, %v1579_v36 }
 0x286   :  { %v1632_v5 = vpack.c.bf16 %v1582_v4, %v1580_v3  ;;  %v1466_v8 = vpop.f32.mrb[76].mxu0 }
 0x287   :  { %v2616_v10 = vadd.f32 %v1466_v8, %v3477_v53  ;;  %v1468_v46 = vpop.f32.mrb[77].mxu0 }
 0x288   :  { %v2617_v11 = vadd.f32 %v1468_v46, %v3481_v55  ;;  %v1470_v37 = vpop.f32.mrb[78].mxu0  ;;  %1866 = vmatprep.mubr.bf16.mxu1 %v1632_v5 }
 0x289   :  { %v2618_v12 = vadd.f32 %v1470_v37, %v3477_v53  ;;  %v1472_v59 = vpop.f32.mrb[79].mxu0  ;;  %1867 = vmatmul.mubr.bf16.gmra.mrb[104].mxu1 %v1631_v57  ;;  %v1583_v34 = vmax.f32 %v2616_v10, 0.0 }
 0x28a   :  { %v2619_v16 = vadd.f32 %v1472_v59, %v3481_v55  ;;  %v1584_v43 = vmax.f32 %v2617_v11, 0.0 }
 0x28b   :  { %v1585_v19 = vmax.f32 %v2618_v12, 0.0 }
 0x28c   :  { %v1586_v24 = vmax.f32 %v2619_v16, 0.0 }
 0x28d   :  { %v1633_v25 = vpack.c.bf16 %v1585_v19, %v1583_v34  ;;  %v2842_v19 = vld [vmem:[%s3667_s7 + $0x20] sm:$0xff]  }
 0x28e   :  { %v1634_v18 = vpack.c.bf16 %v1586_v24, %v1584_v43  ;;  %v1476_v26 = vpop.f32.mrb[80].mxu0  ;;  %2546 = vmatprep.subr.bf16.mxu1 %v2842_v19 }
 0x28f   :  { %v2620_v30 = vadd.f32 %v1476_v26, %v3477_v53  ;;  %v1478_v32 = vpop.f32.mrb[81].mxu0  ;;  %2547 = vmatpush3.bf16.msra.mxu1 %v2842_v19 }
 0x290   :  { %v2621_v33 = vadd.f32 %v1478_v32, %v3481_v55  ;;  %v1480_v39 = vpop.f32.mrb[82].mxu0  ;;  %1874 = vmatprep.mubr.bf16.mxu1 %v1634_v18 }
 0x291   :  { %v2622_v40 = vadd.f32 %v1480_v39, %v3477_v53  ;;  %v1482_v42 = vpop.f32.mrb[83].mxu0  ;;  %1875 = vmatmul.mubr.bf16.gmra.mrb[108].mxu1 %v1633_v25  ;;  %v1587_v38 = vmax.f32 %v2620_v30, 0.0 }
 0x292   :  { %v2623_v48 = vadd.f32 %v1482_v42, %v3481_v55  ;;  %v1588_v17 = vmax.f32 %v2621_v33, 0.0  ;;  %v2843_v33 = vld [vmem:[%s3667_s7 + $0x28] sm:$0xff]  }
 0x293   :  { %v1589_v41 = vmax.f32 %v2622_v40, 0.0  ;;  %2548 = vmatprep.subr.bf16.mxu1 %v2843_v33 }
 0x294   :  { %v1590_v21 = vmax.f32 %v2623_v48, 0.0  ;;  %2549 = vmatpush3.bf16.msra.mxu1 %v2843_v33 }
 0x295   :  { %v1635_v62 = vpack.c.bf16 %v1589_v41, %v1587_v38 }
 0x296   :  { %v1636_v1 = vpack.c.bf16 %v1590_v21, %v1588_v17  ;;  %v1486_v44 = vpop.f32.mrb[84].mxu0  ;;  %v2844_v21 = vld [vmem:[%s3667_s7 + $0x30] sm:$0xff]  }
 0x297   :  { %v2624_v49 = vadd.f32 %v1486_v44, %v3477_v53  ;;  %v1488_v14 = vpop.f32.mrb[85].mxu0  ;;  %2550 = vmatprep.subr.bf16.mxu1 %v2844_v21 }
 0x298   :  { %v2625_v22 = vadd.f32 %v1488_v14, %v3481_v55  ;;  %v1490_v35 = vpop.f32.mrb[86].mxu0  ;;  %1882 = vmatprep.mubr.bf16.mxu1 %v1636_v1  ;;  %2551 = vmatpush3.bf16.msra.mxu1 %v2844_v21 }
 0x299   :  { %v2626_v28 = vadd.f32 %v1490_v35, %v3477_v53  ;;  %v1492_v0 = vpop.f32.mrb[87].mxu0  ;;  %1883 = vmatmul.mubr.bf16.gmra.mrb[112].mxu1 %v1635_v62  ;;  %v1591_v50 = vmax.f32 %v2624_v49, 0.0 }
 0x29a   :  { %v2627_v47 = vadd.f32 %v1492_v0, %v3481_v55  ;;  %v1592_v6 = vmax.f32 %v2625_v22, 0.0 }
 0x29b   :  { %v1593_v7 = vmax.f32 %v2626_v28, 0.0  ;;  %v2845_v28 = vld [vmem:[%s3667_s7 + $0x38] sm:$0xff]  }
 0x29c   :  { %v1594_v27 = vmax.f32 %v2627_v47, 0.0  ;;  %2552 = vmatprep.subr.bf16.mxu1 %v2845_v28 }
 0x29d   :  { %v1637_v29 = vpack.c.bf16 %v1593_v7, %v1591_v50  ;;  %2553 = vmatpush3.bf16.msra.mxu1 %v2845_v28 }
 0x29e   :  { %v1638_v58 = vpack.c.bf16 %v1594_v27, %v1592_v6  ;;  %v1496_v15 = vpop.f32.mrb[88].mxu0 }
 0x29f   :  { %v2628_v20 = vadd.f32 %v1496_v15, %v3477_v53  ;;  %v1498_v23 = vpop.f32.mrb[89].mxu0 }
 0x2a0   :  { %v2629_v31 = vadd.f32 %v1498_v23, %v3481_v55  ;;  %v1500_v9 = vpop.f32.mrb[90].mxu0  ;;  %1890 = vmatprep.mubr.bf16.mxu1 %v1638_v58 }
 0x2a1   :  { %v2630_v45 = vadd.f32 %v1500_v9, %v3477_v53  ;;  %v1502_v13 = vpop.f32.mrb[91].mxu0  ;;  %1891 = vmatmul.mubr.bf16.gmra.mrb[116].mxu1 %v1637_v29  ;;  %v1595_v52 = vmax.f32 %v2628_v20, 0.0 }
 0x2a2   :  { %v2631_v51 = vadd.f32 %v1502_v13, %v3481_v55  ;;  %v1596_v56 = vmax.f32 %v2629_v31, 0.0 }
 0x2a3   :  { %v1597_v54 = vmax.f32 %v2630_v45, 0.0 }
 0x2a4   :  { %v1598_v61 = vmax.f32 %v2631_v51, 0.0 }
 0x2a5   :  { %v1639_v60 = vpack.c.bf16 %v1597_v54, %v1595_v52 }
 0x2a6   :  { %v1640_v63 = vpack.c.bf16 %v1598_v61, %v1596_v56  ;;  %v1506_v36 = vpop.f32.mrb[92].mxu0 }
 0x2a7   :  { %v2632_v2 = vadd.f32 %v1506_v36, %v3477_v53  ;;  %v1508_v3 = vpop.f32.mrb[93].mxu0 }
 0x2a8   :  { %v2633_v4 = vadd.f32 %v1508_v3, %v3481_v55  ;;  %v1510_v57 = vpop.f32.mrb[94].mxu0  ;;  %1898 = vmatprep.mubr.bf16.mxu1 %v1640_v63 }
 0x2a9   :  { %v2634_v5 = vadd.f32 %v1510_v57, %v3477_v53  ;;  %v1512_v8 = vpop.f32.mrb[95].mxu0  ;;  %1899 = vmatmul.mubr.bf16.gmra.mrb[120].mxu1 %v1639_v60  ;;  %v1599_v46 = vmax.f32 %v2632_v2, 0.0 }
 0x2aa   :  { %v2635_v10 = vadd.f32 %v1512_v8, %v3481_v55  ;;  %v1600_v37 = vmax.f32 %v2633_v4, 0.0 }
 0x2ab   :  { %v1601_v11 = vmax.f32 %v2634_v5, 0.0 }
 0x2ac   :  { %v1602_v12 = vmax.f32 %v2635_v10, 0.0 }
 0x2ad   :  { %v1641_v59 = vpack.c.bf16 %v1601_v11, %v1599_v46 }
 0x2ae   :  { %v1642_v16 = vpack.c.bf16 %v1602_v12, %v1600_v37  ;;  %v1516_v34 = vpop.f32.mrb[96].mxu0 }
 0x2af   :  { %v2636_v43 = vadd.f32 %v1516_v34, %v3477_v53  ;;  %v1518_v24 = vpop.f32.mrb[97].mxu0 }
 0x2b0   :  { %v2637_v25 = vadd.f32 %v1518_v24, %v3481_v55  ;;  %v1520_v18 = vpop.f32.mrb[98].mxu0  ;;  %1906 = vmatprep.mubr.bf16.mxu1 %v1642_v16  ;;  %v3574_v16 = vld [vmem:[%s3666_s6] ss:$0 sm:$0xff] }
 0x2b1   :  { %v2638_v26 = vadd.f32 %v1520_v18, %v3477_v53  ;;  %v1522_v30 = vpop.f32.mrb[99].mxu0  ;;  %1907 = vmatmul.mubr.bf16.gmra.mrb[124].mxu1 %v1641_v59  ;;  %v1603_v39 = vmax.f32 %v2636_v43, 0.0 }
 0x2b2   :  { %v2639_v32 = vadd.f32 %v1522_v30, %v3481_v55  ;;  %v1604_v42 = vmax.f32 %v2637_v25, 0.0 }
 0x2b3   :  { %v1605_v40 = vmax.f32 %v2638_v26, 0.0 }
 0x2b4   :  { %v1606_v48 = vmax.f32 %v2639_v32, 0.0 }
 0x2b5   :  { %v1643_v38 = vpack.c.bf16 %v1605_v40, %v1603_v39 }
 0x2b6   :  { %v1644_v41 = vpack.c.bf16 %v1606_v48, %v1604_v42  ;;  %v1526_v17 = vpop.f32.mrb[100].mxu0 }
 0x2b7   :  { %v2640_v62 = vadd.f32 %v1526_v17, %v3477_v53  ;;  %v1528_v1 = vpop.f32.mrb[101].mxu0 }
 0x2b8   :  { %v2641_v44 = vadd.f32 %v1528_v1, %v3481_v55  ;;  %v1530_v49 = vpop.f32.mrb[102].mxu0  ;;  %1914 = vmatprep.mubr.bf16.mxu1 %v1644_v41 }
 0x2b9   :  { %v2642_v14 = vadd.f32 %v1530_v49, %v3477_v53  ;;  %v1532_v22 = vpop.f32.mrb[103].mxu0  ;;  %1915 = vmatmul.mubr.bf16.gmra.mrb[128].mxu1 %v1643_v38  ;;  %v1607_v0 = vmax.f32 %v2640_v62, 0.0 }
 0x2ba   :  { %v2643_v35 = vadd.f32 %v1532_v22, %v3481_v55  ;;  %v1608_v50 = vmax.f32 %v2641_v44, 0.0 }
 0x2bb   :  { %v1609_v47 = vmax.f32 %v2642_v14, 0.0 }
 0x2bc   :  { %v1610_v7 = vmax.f32 %v2643_v35, 0.0 }
 0x2bd   :  { %v1645_v6 = vpack.c.bf16 %v1609_v47, %v1607_v0 }
 0x2be   :  { %v1646_v27 = vpack.c.bf16 %v1610_v7, %v1608_v50  ;;  %v1536_v29 = vpop.f32.mrb[104].mxu0 }
 0x2bf   :  { %v2644_v58 = vadd.f32 %v1536_v29, %v3477_v53  ;;  %v1538_v15 = vpop.f32.mrb[105].mxu0 }
 0x2c0   :  { %v2645_v20 = vadd.f32 %v1538_v15, %v3481_v55  ;;  %v1540_v23 = vpop.f32.mrb[106].mxu0  ;;  %1922 = vmatprep.mubr.bf16.mxu1 %v1646_v27 }
 0x2c1   :  { %v2646_v31 = vadd.f32 %v1540_v23, %v3477_v53  ;;  %v1542_v9 = vpop.f32.mrb[107].mxu0  ;;  %1923 = vmatmul.mubr.bf16.gmra.mrb[132].mxu1 %v1645_v6  ;;  %v1611_v13 = vmax.f32 %v2644_v58, 0.0 }
 0x2c2   :  { %v2647_v45 = vadd.f32 %v1542_v9, %v3481_v55  ;;  %v1612_v52 = vmax.f32 %v2645_v20, 0.0 }
 0x2c3   :  { %v1613_v51 = vmax.f32 %v2646_v31, 0.0 }
 0x2c4   :  { %v1614_v54 = vmax.f32 %v2647_v45, 0.0 }
 0x2c5   :  { %v1647_v56 = vpack.c.bf16 %v1613_v51, %v1611_v13 }
 0x2c6   :  { %v1648_v61 = vpack.c.bf16 %v1614_v54, %v1612_v52  ;;  %v1546_v60 = vpop.f32.mrb[108].mxu0 }
 0x2c7   :  { %v2648_v63 = vadd.f32 %v1546_v60, %v3477_v53  ;;  %v1548_v36 = vpop.f32.mrb[109].mxu0 }
 0x2c8   :  { %v2649_v2 = vadd.f32 %v1548_v36, %v3481_v55  ;;  %v1550_v3 = vpop.f32.mrb[110].mxu0  ;;  %1930 = vmatprep.mubr.bf16.mxu1 %v1648_v61 }
 0x2c9   :  { %v2650_v4 = vadd.f32 %v1550_v3, %v3477_v53  ;;  %v1552_v57 = vpop.f32.mrb[111].mxu0  ;;  %1931 = vmatmul.mubr.bf16.gmra.mrb[136].mxu1 %v1647_v56  ;;  %v1615_v8 = vmax.f32 %v2648_v63, 0.0 }
 0x2ca   :  { %v2651_v5 = vadd.f32 %v1552_v57, %v3481_v55  ;;  %v1616_v46 = vmax.f32 %v2649_v2, 0.0 }
 0x2cb   :  { %v1617_v10 = vmax.f32 %v2650_v4, 0.0 }
 0x2cc   :  { %v1618_v11 = vmax.f32 %v2651_v5, 0.0 }
 0x2cd   :  { %v1649_v37 = vpack.c.bf16 %v1617_v10, %v1615_v8 }
 0x2ce   :  { %v1650_v12 = vpack.c.bf16 %v1618_v11, %v1616_v46 }
 0x2d0   :  { %1938 = vmatprep.mubr.bf16.mxu1 %v1650_v12 }
 0x2d1   :  { %1939 = vmatmul.mubr.bf16.gmra.mrb[140].mxu1 %v1649_v37 }
 0x32c   :  { %v2418_v59 = vpop.f32.mrb[80].mxu1 }
 0x32d   :  { %v2419_v34 = vpop.f32.mrb[81].mxu1 }
 0x32e   :  { %v2420_v53 = vadd.f32 %v2419_v34, %v2418_v59  ;;  %v2421_v19 = vpop.f32.mrb[82].mxu1 }
 0x32f   :  { %v2422_v43 = vpop.f32.mrb[83].mxu1 }
 0x330   :  { %v1821_v55 = vadd.f32 %v2420_v53, %v3574_v16  ;;  %v2423_v24 = vadd.f32 %v2422_v43, %v2421_v19 }
 0x332   :  { %v1824_v25 = vadd.f32 %v2423_v24, %v3574_v16  ;;  %v1947_v18 = vmax.f32 %v1821_v55, 0.0 }
 0x334   :  { %v1948_v26 = vmax.f32 %v1824_v25, 0.0  ;;  %v2424_v30 = vpop.f32.mrb[84].mxu1 }
 0x335   :  { %v2425_v32 = vpop.f32.mrb[85].mxu1 }
 0x336   :  { %v2426_v33 = vadd.f32 %v2425_v32, %v2424_v30  ;;  %v2427_v39 = vpop.f32.mrb[86].mxu1  ;;  %v1979_v40 = vpack.c.bf16 %v1948_v26, %v1947_v18 }
 0x337   :  { %v2428_v42 = vpop.f32.mrb[87].mxu1 }
 0x338   :  { %v1829_v48 = vadd.f32 %v2426_v33, %v3574_v16  ;;  %v2429_v38 = vadd.f32 %v2428_v42, %v2427_v39  ;;  %2554 = vmatprep.mubr.bf16.mxu1 %v1979_v40 }
 0x33a   :  { %v1832_v41 = vadd.f32 %v2429_v38, %v3574_v16  ;;  %v1949_v17 = vmax.f32 %v1829_v48, 0.0 }
 0x33c   :  { %v1950_v21 = vmax.f32 %v1832_v41, 0.0  ;;  %v2430_v62 = vpop.f32.mrb[88].mxu1 }
 0x33d   :  { %v2431_v1 = vpop.f32.mrb[89].mxu1 }
 0x33e   :  { %v1980_v44 = vpack.c.bf16 %v1950_v21, %v1949_v17  ;;  %v2432_v49 = vadd.f32 %v2431_v1, %v2430_v62  ;;  %v2433_v14 = vpop.f32.mrb[90].mxu1 }
 0x33f   :  { %v2434_v22 = vpop.f32.mrb[91].mxu1 }
 0x340   :  { %v1837_v35 = vadd.f32 %v2432_v49, %v3574_v16  ;;  %v2435_v28 = vadd.f32 %v2434_v22, %v2433_v14  ;;  %2555 = vmatmul.mubr.bf16.vlgmr.msra.gmra.mrb[144].mxu1 %v1980_v44 }
 0x342   :  { %v1840_v0 = vadd.f32 %v2435_v28, %v3574_v16  ;;  %v1951_v47 = vmax.f32 %v1837_v35, 0.0 }
 0x344   :  { %v1952_v50 = vmax.f32 %v1840_v0, 0.0  ;;  %v2436_v7 = vpop.f32.mrb[92].mxu1 }
 0x345   :  { %v2437_v6 = vpop.f32.mrb[93].mxu1 }
 0x346   :  { %v2438_v27 = vadd.f32 %v2437_v6, %v2436_v7  ;;  %v2439_v29 = vpop.f32.mrb[94].mxu1  ;;  %v1981_v58 = vpack.c.bf16 %v1952_v50, %v1951_v47 }
 0x347   :  { %v2440_v15 = vpop.f32.mrb[95].mxu1 }
 0x348   :  { %v1845_v20 = vadd.f32 %v2438_v27, %v3574_v16  ;;  %v2441_v23 = vadd.f32 %v2440_v15, %v2439_v29  ;;  %2558 = vmatprep.mubr.bf16.mxu1 %v1981_v58 }
 0x34a   :  { %v1848_v31 = vadd.f32 %v2441_v23, %v3574_v16  ;;  %v1953_v9 = vmax.f32 %v1845_v20, 0.0 }
 0x34c   :  { %v1954_v45 = vmax.f32 %v1848_v31, 0.0  ;;  %v2442_v13 = vpop.f32.mrb[96].mxu1 }
 0x34d   :  { %v2443_v51 = vpop.f32.mrb[97].mxu1 }
 0x34e   :  { %v2444_v52 = vadd.f32 %v2443_v51, %v2442_v13  ;;  %v2445_v54 = vpop.f32.mrb[98].mxu1  ;;  %v1982_v56 = vpack.c.bf16 %v1954_v45, %v1953_v9 }
 0x34f   :  { %v2446_v61 = vpop.f32.mrb[99].mxu1 }
 0x350   :  { %v1853_v60 = vadd.f32 %v2444_v52, %v3574_v16  ;;  %v2447_v63 = vadd.f32 %v2446_v61, %v2445_v54  ;;  %2559 = vmatmul.mubr.bf16.gmra.mrb[148].mxu1 %v1982_v56 }
 0x352   :  { %v1856_v36 = vadd.f32 %v2447_v63, %v3574_v16  ;;  %v1955_v2 = vmax.f32 %v1853_v60, 0.0 }
 0x354   :  { %v1956_v3 = vmax.f32 %v1856_v36, 0.0  ;;  %v2448_v4 = vpop.f32.mrb[100].mxu1 }
 0x355   :  { %v2449_v57 = vpop.f32.mrb[101].mxu1 }
 0x356   :  { %v2450_v5 = vadd.f32 %v2449_v57, %v2448_v4  ;;  %v2451_v8 = vpop.f32.mrb[102].mxu1  ;;  %v1983_v10 = vpack.c.bf16 %v1956_v3, %v1955_v2 }
 0x357   :  { %v2452_v46 = vpop.f32.mrb[103].mxu1 }
 0x358   :  { %v1861_v11 = vadd.f32 %v2450_v5, %v3574_v16  ;;  %v2453_v37 = vadd.f32 %v2452_v46, %v2451_v8  ;;  %2562 = vmatprep.mubr.bf16.mxu1 %v1983_v10 }
 0x35a   :  { %v1864_v12 = vadd.f32 %v2453_v37, %v3574_v16  ;;  %v1957_v59 = vmax.f32 %v1861_v11, 0.0 }
 0x35c   :  { %v1958_v34 = vmax.f32 %v1864_v12, 0.0  ;;  %v2454_v53 = vpop.f32.mrb[104].mxu1 }
 0x35d   :  { %v2455_v19 = vpop.f32.mrb[105].mxu1 }
 0x35e   :  { %v2456_v43 = vadd.f32 %v2455_v19, %v2454_v53  ;;  %v2457_v55 = vpop.f32.mrb[106].mxu1  ;;  %v1984_v24 = vpack.c.bf16 %v1958_v34, %v1957_v59 }
 0x35f   :  { %v2458_v25 = vpop.f32.mrb[107].mxu1 }
 0x360   :  { %v1869_v18 = vadd.f32 %v2456_v43, %v3574_v16  ;;  %v2459_v26 = vadd.f32 %v2458_v25, %v2457_v55  ;;  %2563 = vmatmul.mubr.bf16.gmra.mrb[152].mxu1 %v1984_v24 }
 0x362   :  { %v1872_v30 = vadd.f32 %v2459_v26, %v3574_v16  ;;  %v1959_v32 = vmax.f32 %v1869_v18, 0.0 }
 0x364   :  { %v1960_v33 = vmax.f32 %v1872_v30, 0.0  ;;  %v2460_v39 = vpop.f32.mrb[108].mxu1 }
 0x365   :  { %v2461_v40 = vpop.f32.mrb[109].mxu1 }
 0x366   :  { %v2462_v42 = vadd.f32 %v2461_v40, %v2460_v39  ;;  %v2463_v48 = vpop.f32.mrb[110].mxu1  ;;  %v1985_v38 = vpack.c.bf16 %v1960_v33, %v1959_v32 }
 0x367   :  { %v2464_v41 = vpop.f32.mrb[111].mxu1 }
 0x368   :  { %v1877_v17 = vadd.f32 %v2462_v42, %v3574_v16  ;;  %v2465_v21 = vadd.f32 %v2464_v41, %v2463_v48  ;;  %2566 = vmatprep.mubr.bf16.mxu1 %v1985_v38 }
 0x36a   :  { %v1880_v62 = vadd.f32 %v2465_v21, %v3574_v16  ;;  %v1961_v1 = vmax.f32 %v1877_v17, 0.0 }
 0x36c   :  { %v1962_v44 = vmax.f32 %v1880_v62, 0.0  ;;  %v2466_v49 = vpop.f32.mrb[112].mxu1 }
 0x36d   :  { %v2467_v14 = vpop.f32.mrb[113].mxu1 }
 0x36e   :  { %v2468_v22 = vadd.f32 %v2467_v14, %v2466_v49  ;;  %v2469_v35 = vpop.f32.mrb[114].mxu1  ;;  %v1986_v28 = vpack.c.bf16 %v1962_v44, %v1961_v1 }
 0x36f   :  { %v2470_v0 = vpop.f32.mrb[115].mxu1 }
 0x370   :  { %v1885_v47 = vadd.f32 %v2468_v22, %v3574_v16  ;;  %v2471_v50 = vadd.f32 %v2470_v0, %v2469_v35  ;;  %2567 = vmatmul.mubr.bf16.gmra.mrb[156].mxu1 %v1986_v28 }
 0x372   :  { %v1888_v7 = vadd.f32 %v2471_v50, %v3574_v16  ;;  %v1963_v6 = vmax.f32 %v1885_v47, 0.0 }
 0x374   :  { %v1964_v27 = vmax.f32 %v1888_v7, 0.0  ;;  %v2472_v29 = vpop.f32.mrb[116].mxu1 }
 0x375   :  { %v2473_v58 = vpop.f32.mrb[117].mxu1 }
 0x376   :  { %v2474_v15 = vadd.f32 %v2473_v58, %v2472_v29  ;;  %v2475_v20 = vpop.f32.mrb[118].mxu1  ;;  %v1987_v23 = vpack.c.bf16 %v1964_v27, %v1963_v6 }
 0x377   :  { %v2476_v31 = vpop.f32.mrb[119].mxu1 }
 0x378   :  { %v1893_v9 = vadd.f32 %v2474_v15, %v3574_v16  ;;  %v2477_v45 = vadd.f32 %v2476_v31, %v2475_v20  ;;  %2570 = vmatprep.mubr.bf16.mxu1 %v1987_v23 }
 0x37a   :  { %v1896_v13 = vadd.f32 %v2477_v45, %v3574_v16  ;;  %v1965_v51 = vmax.f32 %v1893_v9, 0.0 }
 0x37c   :  { %v1966_v52 = vmax.f32 %v1896_v13, 0.0  ;;  %v2478_v54 = vpop.f32.mrb[120].mxu1 }
 0x37d   :  { %v2479_v56 = vpop.f32.mrb[121].mxu1 }
 0x37e   :  { %v2480_v61 = vadd.f32 %v2479_v56, %v2478_v54  ;;  %v2481_v60 = vpop.f32.mrb[122].mxu1  ;;  %v1988_v63 = vpack.c.bf16 %v1966_v52, %v1965_v51 }
 0x37f   :  { %v2482_v36 = vpop.f32.mrb[123].mxu1 }
 0x380   :  { %v1901_v2 = vadd.f32 %v2480_v61, %v3574_v16  ;;  %v2483_v3 = vadd.f32 %v2482_v36, %v2481_v60  ;;  %2571 = vmatmul.mubr.bf16.gmra.mrb[160].mxu1 %v1988_v63  ;;  %v3611_v63 = vld [vmem:[%s3668_s8] ss:$0 sm:$0xff]  ;;  %s2899_s8 = smov [#allocation5]  }
 0x381   :  { %s2264_s10 = sshll.u32 %s2899_s8, 4  ;;  %s2265_s10 = int_to_ptr.vmem [resolvable:$true] %s2264_s10 }
 0x382   :  { %v1904_v4 = vadd.f32 %v2483_v3, %v3574_v16  ;;  %v1967_v57 = vmax.f32 %v1901_v2, 0.0  ;;  %s2868_s11 = scalar_lea.vmem %s2265_s10, 4096  ;;  %p2873_p9 = scmp.lt.s32.totalorder %s2265_s10, %s2265_s10 }
 0x383   :  { %p2869_p8 = scmp.ne.s32.totalorder %s2265_s10, %s2868_s11  ;;  %p2874_p10 = scmp.lt.s32.totalorder %s2868_s11, %s2868_s11 }
 0x384   :  { %v1968_v5 = vmax.f32 %v1904_v4, 0.0  ;;  %v2484_v8 = vpop.f32.mrb[124].mxu1 }
 0x385   :  { %v2485_v10 = vpop.f32.mrb[125].mxu1  ;;  %p2875_p11 = por %p2874_p10, %p2873_p9 }
 0x386   :  { %v2486_v46 = vadd.f32 %v2485_v10, %v2484_v8  ;;  %v2487_v11 = vpop.f32.mrb[126].mxu1  ;;  %v1989_v37 = vpack.c.bf16 %v1968_v5, %v1967_v57 }
 0x387   :  { %v2488_v12 = vpop.f32.mrb[127].mxu1  ;;  %p2876_p12 = pnand %p2875_p11, %p2869_p8 }
 0x388   :  { %v1909_v59 = vadd.f32 %v2486_v46, %v3574_v16  ;;  %v2489_v34 = vadd.f32 %v2488_v12, %v2487_v11  ;;  %2574 = vmatprep.mubr.bf16.mxu1 %v1989_v37 }
 0x38a   :  { %v1912_v53 = vadd.f32 %v2489_v34, %v3574_v16  ;;  %v1969_v19 = vmax.f32 %v1909_v59, 0.0 }
 0x38c   :  { %v1970_v43 = vmax.f32 %v1912_v53, 0.0  ;;  %v2490_v55 = vpop.f32.mrb[128].mxu1 }
 0x38d   :  { %v2491_v24 = vpop.f32.mrb[129].mxu1 }
 0x38e   :  { %v2492_v25 = vadd.f32 %v2491_v24, %v2490_v55  ;;  %v2493_v18 = vpop.f32.mrb[130].mxu1  ;;  %v1990_v26 = vpack.c.bf16 %v1970_v43, %v1969_v19 }
 0x38f   :  { %v2494_v30 = vpop.f32.mrb[131].mxu1 }
 0x390   :  { %v1917_v32 = vadd.f32 %v2492_v25, %v3574_v16  ;;  %v2495_v33 = vadd.f32 %v2494_v30, %v2493_v18  ;;  %2575 = vmatmul.mubr.bf16.gmra.mrb[164].mxu1 %v1990_v26 }
 0x392   :  { %v1920_v39 = vadd.f32 %v2495_v33, %v3574_v16  ;;  %v1971_v40 = vmax.f32 %v1917_v32, 0.0 }
 0x394   :  { %v1972_v42 = vmax.f32 %v1920_v39, 0.0  ;;  %v2496_v48 = vpop.f32.mrb[132].mxu1 }
 0x395   :  { %v2497_v38 = vpop.f32.mrb[133].mxu1 }
 0x396   :  { %v2498_v41 = vadd.f32 %v2497_v38, %v2496_v48  ;;  %v2499_v17 = vpop.f32.mrb[134].mxu1  ;;  %v1991_v21 = vpack.c.bf16 %v1972_v42, %v1971_v40 }
 0x397   :  { %v2500_v62 = vpop.f32.mrb[135].mxu1 }
 0x398   :  { %v1925_v1 = vadd.f32 %v2498_v41, %v3574_v16  ;;  %v2501_v44 = vadd.f32 %v2500_v62, %v2499_v17  ;;  %2578 = vmatprep.mubr.bf16.mxu1 %v1991_v21 }
 0x39a   :  { %v1928_v49 = vadd.f32 %v2501_v44, %v3574_v16  ;;  %v1973_v14 = vmax.f32 %v1925_v1, 0.0 }
 0x39c   :  { %v1974_v22 = vmax.f32 %v1928_v49, 0.0  ;;  %v2502_v35 = vpop.f32.mrb[136].mxu1 }
 0x39d   :  { %v2503_v28 = vpop.f32.mrb[137].mxu1 }
 0x39e   :  { %v2504_v0 = vadd.f32 %v2503_v28, %v2502_v35  ;;  %v2505_v47 = vpop.f32.mrb[138].mxu1  ;;  %v1992_v50 = vpack.c.bf16 %v1974_v22, %v1973_v14 }
 0x39f   :  { %v2506_v7 = vpop.f32.mrb[139].mxu1 }
 0x3a0   :  { %v1933_v6 = vadd.f32 %v2504_v0, %v3574_v16  ;;  %v2507_v27 = vadd.f32 %v2506_v7, %v2505_v47  ;;  %2579 = vmatmul.mubr.bf16.gmra.mrb[168].mxu1 %v1992_v50 }
 0x3a2   :  { %v1936_v29 = vadd.f32 %v2507_v27, %v3574_v16  ;;  %v1975_v58 = vmax.f32 %v1933_v6, 0.0 }
 0x3a4   :  { %v1976_v15 = vmax.f32 %v1936_v29, 0.0  ;;  %v2508_v20 = vpop.f32.mrb[140].mxu1 }
 0x3a5   :  { %v2509_v23 = vpop.f32.mrb[141].mxu1 }
 0x3a6   :  { %v2510_v31 = vadd.f32 %v2509_v23, %v2508_v20  ;;  %v2511_v9 = vpop.f32.mrb[142].mxu1  ;;  %v1993_v45 = vpack.c.bf16 %v1976_v15, %v1975_v58 }
 0x3a7   :  { %v2512_v13 = vpop.f32.mrb[143].mxu1 }
 0x3a8   :  { %v1941_v51 = vadd.f32 %v2510_v31, %v3574_v16  ;;  %v2513_v52 = vadd.f32 %v2512_v13, %v2511_v9  ;;  %2582 = vmatprep.mubr.bf16.mxu1 %v1993_v45 }
 0x3aa   :  { %v1944_v54 = vadd.f32 %v2513_v52, %v3574_v16  ;;  %v1977_v56 = vmax.f32 %v1941_v51, 0.0 }
 0x3ac   :  { %v1978_v61 = vmax.f32 %v1944_v54, 0.0 }
 0x3ae   :  { %v1994_v60 = vpack.c.bf16 %v1978_v61, %v1977_v56 }
 0x3b0   :  { %2583 = vmatmul.mubr.bf16.gmra.mrb[172].mxu1 %v1994_v60 }
 0x413   :  { %v2556_v36 = vpop.f32.mrb[144].mxu1 }
 0x414   :  { %v2109_v2 = vadd.f32 %v2556_v36, %v3611_v63  ;;  %v2100_v3 = vpop.f32.mrb[145].mxu1 }
 0x415   :  { %v2101_v4 = vadd.f32 %v3611_v63, %v2100_v3  ;;  %v2557_v57 = vpop.f32.mrb[146].mxu1 }
 0x416   :  { %2229 = vst [vmem:[#allocation5 + $0x10] sm:$0xff] %v2109_v2  ;;  %v2112_v5 = vadd.f32 %v2557_v57, %v3611_v63  ;;  %v2103_v16 = vpop.f32.mrb[147].mxu1 }
 0x417   :  { %2227 = vst [vmem:[#allocation5] sm:$0xff] %v2101_v4  ;;  %v2104_v8 = vadd.f32 %v3611_v63, %v2103_v16 }
 0x418   :  { %2230 = vst [vmem:[#allocation5 + $0x18] sm:$0xff] %v2112_v5 }
 0x419   :  { %2228 = vst [vmem:[#allocation5 + $0x8] sm:$0xff] %v2104_v8 }
 0x423   :  { %v2560_v10 = vpop.f32.mrb[148].mxu1 }
 0x424   :  { %v2125_v46 = vadd.f32 %v2560_v10, %v3611_v63  ;;  %v2116_v11 = vpop.f32.mrb[149].mxu1 }
 0x425   :  { %v2117_v37 = vadd.f32 %v3611_v63, %v2116_v11  ;;  %v2561_v12 = vpop.f32.mrb[150].mxu1 }
 0x426   :  { %2233 = vst [vmem:[#allocation5 + $0x30] sm:$0xff] %v2125_v46  ;;  %v2128_v59 = vadd.f32 %v2561_v12, %v3611_v63  ;;  %v2119_v34 = vpop.f32.mrb[151].mxu1 }
 0x427   :  { %2231 = vst [vmem:[#allocation5 + $0x20] sm:$0xff] %v2117_v37  ;;  %v2120_v53 = vadd.f32 %v3611_v63, %v2119_v34 }
 0x428   :  { %2234 = vst [vmem:[#allocation5 + $0x38] sm:$0xff] %v2128_v59 }
 0x429   :  { %2232 = vst [vmem:[#allocation5 + $0x28] sm:$0xff] %v2120_v53 }
 0x433   :  { %v2564_v19 = vpop.f32.mrb[152].mxu1 }
 0x434   :  { %v2141_v43 = vadd.f32 %v2564_v19, %v3611_v63  ;;  %v2132_v55 = vpop.f32.mrb[153].mxu1 }
 0x435   :  { %v2133_v24 = vadd.f32 %v3611_v63, %v2132_v55  ;;  %v2565_v25 = vpop.f32.mrb[154].mxu1 }
 0x436   :  { %2237 = vst [vmem:[#allocation5 + $0x50] sm:$0xff] %v2141_v43  ;;  %v2144_v18 = vadd.f32 %v2565_v25, %v3611_v63  ;;  %v2135_v26 = vpop.f32.mrb[155].mxu1 }
 0x437   :  { %2235 = vst [vmem:[#allocation5 + $0x40] sm:$0xff] %v2133_v24  ;;  %v2136_v30 = vadd.f32 %v3611_v63, %v2135_v26 }
 0x438   :  { %2238 = vst [vmem:[#allocation5 + $0x58] sm:$0xff] %v2144_v18 }
 0x439   :  { %2236 = vst [vmem:[#allocation5 + $0x48] sm:$0xff] %v2136_v30 }
 0x443   :  { %v2568_v32 = vpop.f32.mrb[156].mxu1 }
 0x444   :  { %v2157_v33 = vadd.f32 %v2568_v32, %v3611_v63  ;;  %v2148_v39 = vpop.f32.mrb[157].mxu1 }
 0x445   :  { %v2149_v40 = vadd.f32 %v3611_v63, %v2148_v39  ;;  %v2569_v42 = vpop.f32.mrb[158].mxu1 }
 0x446   :  { %2241 = vst [vmem:[#allocation5 + $0x70] sm:$0xff] %v2157_v33  ;;  %v2160_v48 = vadd.f32 %v2569_v42, %v3611_v63  ;;  %v2151_v38 = vpop.f32.mrb[159].mxu1 }
 0x447   :  { %2239 = vst [vmem:[#allocation5 + $0x60] sm:$0xff] %v2149_v40  ;;  %v2152_v41 = vadd.f32 %v3611_v63, %v2151_v38 }
 0x448   :  { %2242 = vst [vmem:[#allocation5 + $0x78] sm:$0xff] %v2160_v48 }
 0x449   :  { %2240 = vst [vmem:[#allocation5 + $0x68] sm:$0xff] %v2152_v41 }
 0x453   :  { %v2572_v17 = vpop.f32.mrb[160].mxu1 }
 0x454   :  { %v2173_v21 = vadd.f32 %v2572_v17, %v3611_v63  ;;  %v2164_v62 = vpop.f32.mrb[161].mxu1 }
 0x455   :  { %v2165_v1 = vadd.f32 %v3611_v63, %v2164_v62  ;;  %v2573_v44 = vpop.f32.mrb[162].mxu1 }
 0x456   :  { %2245 = vst [vmem:[#allocation5 + $0x90] sm:$0xff] %v2173_v21  ;;  %v2176_v49 = vadd.f32 %v2573_v44, %v3611_v63  ;;  %v2167_v14 = vpop.f32.mrb[163].mxu1 }
 0x457   :  { %2243 = vst [vmem:[#allocation5 + $0x80] sm:$0xff] %v2165_v1  ;;  %v2168_v22 = vadd.f32 %v3611_v63, %v2167_v14 }
 0x458   :  { %2246 = vst [vmem:[#allocation5 + $0x98] sm:$0xff] %v2176_v49 }
 0x459   :  { %2244 = vst [vmem:[#allocation5 + $0x88] sm:$0xff] %v2168_v22 }
 0x463   :  { %v2576_v35 = vpop.f32.mrb[164].mxu1 }
 0x464   :  { %v2189_v28 = vadd.f32 %v2576_v35, %v3611_v63  ;;  %v2180_v0 = vpop.f32.mrb[165].mxu1 }
 0x465   :  { %v2181_v47 = vadd.f32 %v3611_v63, %v2180_v0  ;;  %v2577_v50 = vpop.f32.mrb[166].mxu1 }
 0x466   :  { %2249 = vst [vmem:[#allocation5 + $0xb0] sm:$0xff] %v2189_v28  ;;  %v2192_v7 = vadd.f32 %v2577_v50, %v3611_v63  ;;  %v2183_v6 = vpop.f32.mrb[167].mxu1 }
 0x467   :  { %2247 = vst [vmem:[#allocation5 + $0xa0] sm:$0xff] %v2181_v47  ;;  %v2184_v27 = vadd.f32 %v3611_v63, %v2183_v6 }
 0x468   :  { %2250 = vst [vmem:[#allocation5 + $0xb8] sm:$0xff] %v2192_v7 }
 0x469   :  { %2248 = vst [vmem:[#allocation5 + $0xa8] sm:$0xff] %v2184_v27 }
 0x473   :  { %v2580_v29 = vpop.f32.mrb[168].mxu1 }
 0x474   :  { %v2205_v58 = vadd.f32 %v2580_v29, %v3611_v63  ;;  %v2196_v15 = vpop.f32.mrb[169].mxu1 }
 0x475   :  { %v2197_v20 = vadd.f32 %v3611_v63, %v2196_v15  ;;  %v2581_v23 = vpop.f32.mrb[170].mxu1 }
 0x476   :  { %2253 = vst [vmem:[#allocation5 + $0xd0] sm:$0xff] %v2205_v58  ;;  %v2208_v31 = vadd.f32 %v2581_v23, %v3611_v63  ;;  %v2199_v9 = vpop.f32.mrb[171].mxu1 }
 0x477   :  { %2251 = vst [vmem:[#allocation5 + $0xc0] sm:$0xff] %v2197_v20  ;;  %v2200_v45 = vadd.f32 %v3611_v63, %v2199_v9 }
 0x478   :  { %2254 = vst [vmem:[#allocation5 + $0xd8] sm:$0xff] %v2208_v31 }
 0x479   :  { %2252 = vst [vmem:[#allocation5 + $0xc8] sm:$0xff] %v2200_v45 }
 0x483   :  { %v2584_v13 = vpop.f32.mrb[172].mxu1 }
 0x484   :  { %v2221_v51 = vadd.f32 %v2584_v13, %v3611_v63  ;;  %v2212_v52 = vpop.f32.mrb[173].mxu1 }
 0x485   :  { %v2213_v54 = vadd.f32 %v3611_v63, %v2212_v52  ;;  %v2585_v56 = vpop.f32.mrb[174].mxu1 }
 0x486   :  { %2257 = vst [vmem:[#allocation5 + $0xf0] sm:$0xff] %v2221_v51  ;;  %v2224_v61 = vadd.f32 %v2585_v56, %v3611_v63  ;;  %v2215_v60 = vpop.f32.mrb[175].mxu1 }
 0x487   :  { %2255 = vst [vmem:[#allocation5 + $0xe0] sm:$0xff] %v2213_v54  ;;  %v2216_v36 = vadd.f32 %v3611_v63, %v2215_v60 }
 0x488   :  { %2258 = vst [vmem:[#allocation5 + $0xf8] sm:$0xff] %v2224_v61 }
 0x489   :  { %2256 = vst [vmem:[#allocation5 + $0xe8] sm:$0xff] %v2216_v36 }
 0x48a   :  { %2879 = shalt.err (!%p2876_p12)
}
 0x48b   :  { %s2880_s14 = scalar_lea.hbm %s3669_s9, 4096 }
 0x48c   :  { %p2881_p13 = scmp.ne.s32.totalorder %s3669_s9, %s2880_s14  ;;  %p2884_p0 = scmp.lt.u32.totalorder %s2880_s14, %s3669_s9 }
 0x48e   :  { %p2886_p1 = pnand %p2884_p0, %p2881_p13 }
 0x490   :  { %2889 = shalt.err (!%p2886_p1)
}
 0x491   :  { %2270 = dma.vmem_to_hbm [thread:$0]  %s2265_s10, 4096, %s3669_s9, [#allocation4], %s2895_s19, %s2895_s19, %s2896_s20  }
 0x492   :  { %2892 = dma.done.wait [#allocation4], 4096  }
 0x493   :  { %2893 = vsyncadd [#allocation4], 4294963200 }
 0x494   :  { %2274 = vsyncpa [#allocation3], 1 }
 0x495   :  { %2275 = vsyncpa [#allocation4], 1 }

</bundles_post_ra>
